<compile_context>
chip_gen: v7x
topology: tpu7x:2x2x1
jax: 0.10.0
libtpu: 0.0.40
codegen_flags: <defaults>
</compile_context>

<pallas_src>
import math
import numpy as np

import jax
import jax.numpy as jnp
from jax import lax
from jax.experimental import pallas as pl
from jax.experimental.pallas import tpu as pltpu


def _choose_row_tile(Ho, Wo):
    """Pooled rows per grid step: a divisor of Ho whose flattened tile is a
    multiple of 128 lanes (keeps the lane-dense output block legal under the
    (8,128) rule) and big enough to amortize per-step overhead.  Falls back to
    the whole image (toy sizes)."""
    valid = [t for t in range(1, Ho + 1) if Ho % t == 0 and (t * Wo) % 128 == 0]
    if not valid:
        return Ho
    for t in valid:
        if t * Wo >= 1024:
            return t
    return valid[-1]


def encoder_forward(x_nchw, mask_nchw, w_oihw, neg_slope=0.1):
    """Encoder.forward for kernel_size=3, bias=False, maxpool=True."""
    B, Cin, H, W = x_nchw.shape
    Cout = w_oihw.shape[0]
    assert H % 2 == 0 and W % 2 == 0, "2x2/2 maxpool path assumes even H, W"
    Ho, Wo = H // 2, W // 2
    Cin1 = Cin + 1            # x*mask channels + channel-summed mask channel
    C1 = Cout + 1             # conv channels + mask-sum column
    C2 = 2 * Cin1             # even-column plane ++ odd-column plane
    Wh = Wo + 1               # parity-plane width (incl. right halo column)

    TH = _choose_row_tile(Ho, Wo)       # pooled rows per grid step
    n_t = Ho // TH
    Hb = 2 * TH + 2                     # input rows per step (incl. conv halo)

    # ------------- wrapper: layout only (pad, mask-mul, parity split) ----------
    # A single O(Cin*H*W) elementwise/gather pass that XLA fuses into one
    # materialized kernel input -- the old 18x HBM im2col is gone.
    x_nhwc = jnp.transpose(x_nchw, (0, 2, 3, 1)).astype(jnp.float32)
    m_nhwc = jnp.transpose(mask_nchw, (0, 2, 3, 1)).astype(jnp.float32)
    xp = jnp.pad(x_nhwc, ((0, 0), (1, 1), (1, 1), (0, 0)), mode="edge")
    mp = jnp.pad(m_nhwc, ((0, 0), (1, 1), (1, 1), (0, 0)), constant_values=1.0)
    xm = xp * mp                                   # mask applied before the conv
    mc = jnp.sum(mp, axis=-1, keepdims=True)       # channel-summed mask
    xin = jnp.concatenate([xm, mc], axis=-1)       # (B, H+2, W+2, Cin1)
    # Split columns by parity (even cols ++ odd cols): the horizontal half of the
    # 2x2 max-pool becomes an elementwise maximum of the two phases in-kernel.
    xin_eo = jnp.concatenate([xin[:, :, 0::2, :], xin[:, :, 1::2, :]], axis=-1)
    # Overlapping row bands (2 halo rows each) so row tiles need no halo logic.
    if n_t == 1:
        xin_b = xin_eo                                          # (B, Hb, Wh, C2)
    else:
        xin_b = jnp.stack(
            [xin_eo[:, 2 * TH * t: 2 * TH * t + Hb] for t in range(n_t)], axis=1
        ).reshape(B * n_t, Hb, Wh, C2)

    # Augmented weights: per vertical tap ki, a (3*Cin1, C1) matrix holding the
    # three horizontal taps' conv weights plus an all-ones entry that makes the
    # mask-conv sum fall out of the same dot as output column Cout.
    w_t = jnp.transpose(w_oihw, (2, 3, 1, 0)).astype(jnp.float32)  # (3,3,Cin,Cout)
    w_k = jnp.zeros((3, 3, Cin1, C1), jnp.float32)
    w_k = w_k.at[:, :, :Cin, :Cout].set(w_t)
    w_k = w_k.at[:, :, Cin, Cout].set(1.0)
    w_k = w_k.reshape(3, 3 * Cin1, C1)

    R = 2 * TH * Wo            # pre-pool rows per step (per horizontal phase)
    RP = TH * Wo               # pooled rows per step
    PADC = (-C1) % 128         # lane pad so the final XLU transpose is aligned

    # (plane, column-offset) of padded input column 2b + h + kj in parity planes.
    taps = [[((h + kj) % 2, (h + kj) // 2) for kj in range(3)] for h in range(2)]

    def kernel(xin_ref, w_ref, out_ref):
        # --- partial conv + mask-sum: in-VMEM im2col feeding 6 accumulating dots
        phase = []
        for h in range(2):                       # output-column parity (h-pool)
            acc = None
            for ki in range(3):                  # vertical tap
                wins = []
                for kj in range(3):              # horizontal tap
                    plane, d = taps[h][kj]
                    wins.append(
                        xin_ref[ki:ki + 2 * TH, d:d + Wo,
                                plane * Cin1:(plane + 1) * Cin1])
                xk = jnp.concatenate(wins, axis=-1).reshape(R, 3 * Cin1)
                part = jnp.dot(xk, w_ref[ki], preferred_element_type=jnp.float32)
                acc = part if acc is None else acc + part        # (R, C1)
            msum = acc[:, Cout:C1]                               # mask-conv sum
            umc = jnp.clip(msum, 0.0, 1.0)
            scale = 9.0 * pl.reciprocal(msum + 1e-8, approx=True) * umc   # EUP
            phase.append(jnp.concatenate([acc[:, :Cout] * scale, umc], axis=-1))
        # --- 2x2/2 max-pool: horizontal = elementwise max of the parity phases,
        #     vertical = aligned sublane-slab max (Wo multiple of 8 keeps it VPU)
        hmax = jnp.maximum(phase[0], phase[1])                   # (R, C1)
        v3 = hmax.reshape(TH, 2 * Wo, C1)
        pooled = jnp.maximum(v3[:, :Wo, :], v3[:, Wo:, :]).reshape(RP, C1)
        # LeakyReLU after the pool (max commutes with monotone maps); it is the
        # identity on the clamped mask column, so one jnp.where covers both.
        pooled = jnp.where(pooled >= 0, pooled, neg_slope * pooled)
        # --- lane-dense store: pad lanes to 128, transpose once on the XLU and
        #     write (C1, rows) so the output leaves the kernel in NCHW order.
        if PADC:
            pooled = jnp.concatenate(
                [pooled, jnp.zeros((RP, PADC), jnp.float32)], axis=-1)
        out_ref[...] = jnp.transpose(pooled)[:C1, :]

    out = pl.pallas_call(
        kernel,
        out_shape=jax.ShapeDtypeStruct((B, C1, Ho * Wo), jnp.float32),
        grid=(B, n_t),
        in_specs=[
            pl.BlockSpec((None, Hb, Wh, C2), lambda b, t: (b * n_t + t, 0, 0, 0)),
            pl.BlockSpec((3, 3 * Cin1, C1), lambda b, t: (0, 0, 0)),
        ],
        out_specs=pl.BlockSpec((None, C1, TH * Wo), lambda b, t: (b, 0, t)),
        compiler_params=pltpu.CompilerParams(
            dimension_semantics=("parallel", "parallel")),
    )(xin_b, w_k)

    out_x = out[:, :Cout, :].reshape(B, Cout, Ho, Wo)
    # The mask conv has all-ones weights -> the update mask is channel-uniform:
    # pooled once as one column in the kernel, broadcast to Cout channels here.
    out_m = jnp.broadcast_to(out[:, Cout:C1, :].reshape(B, 1, Ho, Wo),
                             (B, Cout, Ho, Wo))
    return out_x, out_m


def reference(x_nchw, m_nchw, w_oihw, neg_slope=0.1):
    """Pure-JAX reference of Encoder.forward (for correctness check)."""
    xp = jnp.pad(x_nchw, ((0, 0), (0, 0), (1, 1), (1, 1)), mode="edge")
    mp = jnp.pad(m_nchw, ((0, 0), (0, 0), (1, 1), (1, 1)), constant_values=1.0)
    dn = ("NCHW", "OIHW", "NCHW")
    out = lax.conv_general_dilated(xp * mp, w_oihw, (1, 1), "VALID",
                                   dimension_numbers=dn)
    um = lax.conv_general_dilated(mp, jnp.ones_like(w_oihw), (1, 1), "VALID",
                                  dimension_numbers=dn)
    ratio = 9.0 / (um + 1e-8)
    umc = jnp.clip(um, 0.0, 1.0)
    out = out * (ratio * umc)
    out = jnp.where(out >= 0, out, neg_slope * out)
    umc = jnp.where(umc >= 0, umc, neg_slope * umc)
    pool = lambda v: lax.reduce_window(v, -jnp.inf, lax.max,
                                       (1, 1, 2, 2), (1, 1, 2, 2), "VALID")
    return pool(out), pool(umc)


if __name__ == "__main__":
    B, Cin, Cout, H, W = 2, 4, 8, 16, 16
    key = jax.random.PRNGKey(0)
    kx, km, kw = jax.random.split(key, 3)

    x = jax.random.normal(kx, (B, Cin, H, W), jnp.float32)
    mask = (jax.random.uniform(km, (B, Cin, H, W)) > 0.3).astype(jnp.float32)
    # Deterministic kaiming_uniform(a=sqrt(5))-style init for the 3x3 conv weight.
    bound = 1.0 / math.sqrt(Cin * 3 * 3)
    w = jax.random.uniform(kw, (Cout, Cin, 3, 3), jnp.float32, -bound, bound)

    out_x, out_m = jax.jit(encoder_forward)(x, mask, w)
    jax.block_until_ready((out_x, out_m))

    assert out_x.shape == (B, Cout, H // 2, W // 2)
    assert out_m.shape == (B, Cout, H // 2, W // 2)

    ref_x, ref_m = reference(x, mask, w)
    np.testing.assert_allclose(np.asarray(out_x), np.asarray(ref_x),
                               rtol=1e-3, atol=1e-3)
    np.testing.assert_allclose(np.asarray(out_m), np.asarray(ref_m),
                               rtol=1e-3, atol=1e-3)

    print("KERNEL_OK")
</pallas_src>

<mosaic_0001>
module attributes {stable_mosaic.version = 11 : i64} {
  func.func @kernel(%arg0: i32, %arg1: i32, %arg2: memref<1x18x9x10xf32, #tpu.memory_space<vmem>>, %arg3: memref<3x15x9xf32, #tpu.memory_space<vmem>>, %arg4: memref<1x9x64xf32, #tpu.memory_space<vmem>>) attributes {dimension_semantics = [#tpu.dimension_semantics<parallel>, #tpu.dimension_semantics<parallel>], iteration_bounds = array<i64: 2, 1>, scalar_prefetch = 0 : i64, scratch_operands = 0 : i64, tpu.core_type = #tpu.core_type<tc>, window_params = [{transform_indices = @transform_0, window_bounds = array<i64: 1, 18, 9, 10>}, {pipeline_mode = #tpu.pipeline_mode<synchronous>, transform_indices = @transform_1, window_bounds = array<i64: 3, 15, 9>}, {transform_indices = @transform_2, window_bounds = array<i64: 1, 9, 64>}]} {
    %c0 = arith.constant 0 : index
    %c0_0 = arith.constant 0 : index
    %c0_1 = arith.constant 0 : index
    %c0_2 = arith.constant 0 : index
    %0 = vector.load %arg2[%c0, %c0_0, %c0_1, %c0_2] : memref<1x18x9x10xf32, #tpu.memory_space<vmem>>, vector<1x16x8x5xf32>
    %1 = vector.shape_cast %0 : vector<1x16x8x5xf32> to vector<16x8x5xf32>
    %c0_3 = arith.constant 0 : index
    %c0_4 = arith.constant 0 : index
    %c0_5 = arith.constant 0 : index
    %c5 = arith.constant 5 : index
    %2 = vector.load %arg2[%c0_3, %c0_4, %c0_5, %c5] : memref<1x18x9x10xf32, #tpu.memory_space<vmem>>, vector<1x16x8x5xf32>
    %3 = vector.shape_cast %2 : vector<1x16x8x5xf32> to vector<16x8x5xf32>
    %c0_6 = arith.constant 0 : index
    %c0_7 = arith.constant 0 : index
    %c1 = arith.constant 1 : index
    %c0_8 = arith.constant 0 : index
    %4 = vector.load %arg2[%c0_6, %c0_7, %c1, %c0_8] : memref<1x18x9x10xf32, #tpu.memory_space<vmem>>, vector<1x16x8x5xf32>
    %5 = vector.shape_cast %4 : vector<1x16x8x5xf32> to vector<16x8x5xf32>
    %6 = tpu.concatenate %1, %3, %5 in 2 : vector<16x8x5xf32>, vector<16x8x5xf32>, vector<16x8x5xf32> -> vector<16x8x15xf32>
    %7 = vector.shape_cast %6 : vector<16x8x15xf32> to vector<128x15xf32>
    %c0_9 = arith.constant 0 : index
    %c0_10 = arith.constant 0 : index
    %c0_11 = arith.constant 0 : index
    %8 = vector.load %arg3[%c0_9, %c0_10, %c0_11] : memref<3x15x9xf32, #tpu.memory_space<vmem>>, vector<1x15x9xf32>
    %9 = vector.shape_cast %8 : vector<1x15x9xf32> to vector<15x9xf32>
    %cst = arith.constant dense<0.000000e+00> : vector<128x9xf32>
    %10 = tpu.matmul %7, %9, %cst {dimension_numbers = #tpu.dot_dimension_numbers<[1], [0], [0], [1], [0, 0, 1, 1], [], []>} : vector<128x15xf32>, vector<15x9xf32>, vector<128x9xf32> -> vector<128x9xf32>
    %c0_12 = arith.constant 0 : index
    %c1_13 = arith.constant 1 : index
    %c0_14 = arith.constant 0 : index
    %c0_15 = arith.constant 0 : index
    %11 = vector.load %arg2[%c0_12, %c1_13, %c0_14, %c0_15] : memref<1x18x9x10xf32, #tpu.memory_space<vmem>>, vector<1x16x8x5xf32>
    %12 = vector.shape_cast %11 : vector<1x16x8x5xf32> to vector<16x8x5xf32>
    %c0_16 = arith.constant 0 : index
    %c1_17 = arith.constant 1 : index
    %c0_18 = arith.constant 0 : index
    %c5_19 = arith.constant 5 : index
    %13 = vector.load %arg2[%c0_16, %c1_17, %c0_18, %c5_19] : memref<1x18x9x10xf32, #tpu.memory_space<vmem>>, vector<1x16x8x5xf32>
    %14 = vector.shape_cast %13 : vector<1x16x8x5xf32> to vector<16x8x5xf32>
    %c0_20 = arith.constant 0 : index
    %c1_21 = arith.constant 1 : index
    %c1_22 = arith.constant 1 : index
    %c0_23 = arith.constant 0 : index
    %15 = vector.load %arg2[%c0_20, %c1_21, %c1_22, %c0_23] : memref<1x18x9x10xf32, #tpu.memory_space<vmem>>, vector<1x16x8x5xf32>
    %16 = vector.shape_cast %15 : vector<1x16x8x5xf32> to vector<16x8x5xf32>
    %17 = tpu.concatenate %12, %14, %16 in 2 : vector<16x8x5xf32>, vector<16x8x5xf32>, vector<16x8x5xf32> -> vector<16x8x15xf32>
    %18 = vector.shape_cast %17 : vector<16x8x15xf32> to vector<128x15xf32>
    %c1_24 = arith.constant 1 : index
    %c0_25 = arith.constant 0 : index
    %c0_26 = arith.constant 0 : index
    %19 = vector.load %arg3[%c1_24, %c0_25, %c0_26] : memref<3x15x9xf32, #tpu.memory_space<vmem>>, vector<1x15x9xf32>
    %20 = vector.shape_cast %19 : vector<1x15x9xf32> to vector<15x9xf32>
    %cst_27 = arith.constant dense<0.000000e+00> : vector<128x9xf32>
    %21 = tpu.matmul %18, %20, %cst_27 {dimension_numbers = #tpu.dot_dimension_numbers<[1], [0], [0], [1], [0, 0, 1, 1], [], []>} : vector<128x15xf32>, vector<15x9xf32>, vector<128x9xf32> -> vector<128x9xf32>
    %22 = arith.addf %10, %21 : vector<128x9xf32>
    %c0_28 = arith.constant 0 : index
    %c2 = arith.constant 2 : index
    %c0_29 = arith.constant 0 : index
    %c0_30 = arith.constant 0 : index
    %23 = vector.load %arg2[%c0_28, %c2, %c0_29, %c0_30] : memref<1x18x9x10xf32, #tpu.memory_space<vmem>>, vector<1x16x8x5xf32>
    %24 = vector.shape_cast %23 : vector<1x16x8x5xf32> to vector<16x8x5xf32>
    %c0_31 = arith.constant 0 : index
    %c2_32 = arith.constant 2 : index
    %c0_33 = arith.constant 0 : index
    %c5_34 = arith.constant 5 : index
    %25 = vector.load %arg2[%c0_31, %c2_32, %c0_33, %c5_34] : memref<1x18x9x10xf32, #tpu.memory_space<vmem>>, vector<1x16x8x5xf32>
    %26 = vector.shape_cast %25 : vector<1x16x8x5xf32> to vector<16x8x5xf32>
    %c0_35 = arith.constant 0 : index
    %c2_36 = arith.constant 2 : index
    %c1_37 = arith.constant 1 : index
    %c0_38 = arith.constant 0 : index
    %27 = vector.load %arg2[%c0_35, %c2_36, %c1_37, %c0_38] : memref<1x18x9x10xf32, #tpu.memory_space<vmem>>, vector<1x16x8x5xf32>
    %28 = vector.shape_cast %27 : vector<1x16x8x5xf32> to vector<16x8x5xf32>
    %29 = tpu.concatenate %24, %26, %28 in 2 : vector<16x8x5xf32>, vector<16x8x5xf32>, vector<16x8x5xf32> -> vector<16x8x15xf32>
    %30 = vector.shape_cast %29 : vector<16x8x15xf32> to vector<128x15xf32>
    %c2_39 = arith.constant 2 : index
    %c0_40 = arith.constant 0 : index
    %c0_41 = arith.constant 0 : index
    %31 = vector.load %arg3[%c2_39, %c0_40, %c0_41] : memref<3x15x9xf32, #tpu.memory_space<vmem>>, vector<1x15x9xf32>
    %32 = vector.shape_cast %31 : vector<1x15x9xf32> to vector<15x9xf32>
    %cst_42 = arith.constant dense<0.000000e+00> : vector<128x9xf32>
    %33 = tpu.matmul %30, %32, %cst_42 {dimension_numbers = #tpu.dot_dimension_numbers<[1], [0], [0], [1], [0, 0, 1, 1], [], []>} : vector<128x15xf32>, vector<15x9xf32>, vector<128x9xf32> -> vector<128x9xf32>
    %34 = arith.addf %22, %33 : vector<128x9xf32>
    %35 = vector.extract_strided_slice %34 {offsets = [0, 8], sizes = [128, 1], strides = [1, 1]} : vector<128x9xf32> to vector<128x1xf32>
    %cst_43 = arith.constant 0.000000e+00 : f32
    %cst_44 = arith.constant 1.000000e+00 : f32
    %36 = vector.broadcast %cst_43 : f32 to vector<128x1xf32>
    %37 = arith.maximumf %36, %35 : vector<128x1xf32>
    %38 = vector.broadcast %cst_44 : f32 to vector<128x1xf32>
    %39 = arith.minimumf %38, %37 : vector<128x1xf32>
    %cst_45 = arith.constant 9.99999993E-9 : f32
    %40 = vector.broadcast %cst_45 : f32 to vector<128x1xf32>
    %41 = arith.addf %35, %40 : vector<128x1xf32>
    %42 = tpu.reciprocal %41 {approx = true} : vector<128x1xf32> -> vector<128x1xf32>
    %cst_46 = arith.constant 9.000000e+00 : f32
    %43 = vector.broadcast %cst_46 : f32 to vector<128x1xf32>
    %44 = arith.mulf %43, %42 : vector<128x1xf32>
    %45 = arith.mulf %44, %39 : vector<128x1xf32>
    %46 = vector.extract_strided_slice %34 {offsets = [0, 0], sizes = [128, 8], strides = [1, 1]} : vector<128x9xf32> to vector<128x8xf32>
    %47 = vector.broadcast %45 : vector<128x1xf32> to vector<128x8xf32>
    %48 = arith.mulf %46, %47 : vector<128x8xf32>
    %49 = tpu.concatenate %48, %39 in 1 : vector<128x8xf32>, vector<128x1xf32> -> vector<128x9xf32>
    %c0_47 = arith.constant 0 : index
    %c0_48 = arith.constant 0 : index
    %c0_49 = arith.constant 0 : index
    %c5_50 = arith.constant 5 : index
    %50 = vector.load %arg2[%c0_47, %c0_48, %c0_49, %c5_50] : memref<1x18x9x10xf32, #tpu.memory_space<vmem>>, vector<1x16x8x5xf32>
    %51 = vector.shape_cast %50 : vector<1x16x8x5xf32> to vector<16x8x5xf32>
    %c0_51 = arith.constant 0 : index
    %c0_52 = arith.constant 0 : index
    %c1_53 = arith.constant 1 : index
    %c0_54 = arith.constant 0 : index
    %52 = vector.load %arg2[%c0_51, %c0_52, %c1_53, %c0_54] : memref<1x18x9x10xf32, #tpu.memory_space<vmem>>, vector<1x16x8x5xf32>
    %53 = vector.shape_cast %52 : vector<1x16x8x5xf32> to vector<16x8x5xf32>
    %c0_55 = arith.constant 0 : index
    %c0_56 = arith.constant 0 : index
    %c1_57 = arith.constant 1 : index
    %c5_58 = arith.constant 5 : index
    %54 = vector.load %arg2[%c0_55, %c0_56, %c1_57, %c5_58] : memref<1x18x9x10xf32, #tpu.memory_space<vmem>>, vector<1x16x8x5xf32>
    %55 = vector.shape_cast %54 : vector<1x16x8x5xf32> to vector<16x8x5xf32>
    %56 = tpu.concatenate %51, %53, %55 in 2 : vector<16x8x5xf32>, vector<16x8x5xf32>, vector<16x8x5xf32> -> vector<16x8x15xf32>
    %57 = vector.shape_cast %56 : vector<16x8x15xf32> to vector<128x15xf32>
    %c0_59 = arith.constant 0 : index
    %c0_60 = arith.constant 0 : index
    %c0_61 = arith.constant 0 : index
    %58 = vector.load %arg3[%c0_59, %c0_60, %c0_61] : memref<3x15x9xf32, #tpu.memory_space<vmem>>, vector<1x15x9xf32>
    %59 = vector.shape_cast %58 : vector<1x15x9xf32> to vector<15x9xf32>
    %cst_62 = arith.constant dense<0.000000e+00> : vector<128x9xf32>
    %60 = tpu.matmul %57, %59, %cst_62 {dimension_numbers = #tpu.dot_dimension_numbers<[1], [0], [0], [1], [0, 0, 1, 1], [], []>} : vector<128x15xf32>, vector<15x9xf32>, vector<128x9xf32> -> vector<128x9xf32>
    %c0_63 = arith.constant 0 : index
    %c1_64 = arith.constant 1 : index
    %c0_65 = arith.constant 0 : index
    %c5_66 = arith.constant 5 : index
    %61 = vector.load %arg2[%c0_63, %c1_64, %c0_65, %c5_66] : memref<1x18x9x10xf32, #tpu.memory_space<vmem>>, vector<1x16x8x5xf32>
    %62 = vector.shape_cast %61 : vector<1x16x8x5xf32> to vector<16x8x5xf32>
    %c0_67 = arith.constant 0 : index
    %c1_68 = arith.constant 1 : index
    %c1_69 = arith.constant 1 : index
    %c0_70 = arith.constant 0 : index
    %63 = vector.load %arg2[%c0_67, %c1_68, %c1_69, %c0_70] : memref<1x18x9x10xf32, #tpu.memory_space<vmem>>, vector<1x16x8x5xf32>
    %64 = vector.shape_cast %63 : vector<1x16x8x5xf32> to vector<16x8x5xf32>
    %c0_71 = arith.constant 0 : index
    %c1_72 = arith.constant 1 : index
    %c1_73 = arith.constant 1 : index
    %c5_74 = arith.constant 5 : index
    %65 = vector.load %arg2[%c0_71, %c1_72, %c1_73, %c5_74] : memref<1x18x9x10xf32, #tpu.memory_space<vmem>>, vector<1x16x8x5xf32>
    %66 = vector.shape_cast %65 : vector<1x16x8x5xf32> to vector<16x8x5xf32>
    %67 = tpu.concatenate %62, %64, %66 in 2 : vector<16x8x5xf32>, vector<16x8x5xf32>, vector<16x8x5xf32> -> vector<16x8x15xf32>
    %68 = vector.shape_cast %67 : vector<16x8x15xf32> to vector<128x15xf32>
    %c1_75 = arith.constant 1 : index
    %c0_76 = arith.constant 0 : index
    %c0_77 = arith.constant 0 : index
    %69 = vector.load %arg3[%c1_75, %c0_76, %c0_77] : memref<3x15x9xf32, #tpu.memory_space<vmem>>, vector<1x15x9xf32>
    %70 = vector.shape_cast %69 : vector<1x15x9xf32> to vector<15x9xf32>
    %cst_78 = arith.constant dense<0.000000e+00> : vector<128x9xf32>
    %71 = tpu.matmul %68, %70, %cst_78 {dimension_numbers = #tpu.dot_dimension_numbers<[1], [0], [0], [1], [0, 0, 1, 1], [], []>} : vector<128x15xf32>, vector<15x9xf32>, vector<128x9xf32> -> vector<128x9xf32>
    %72 = arith.addf %60, %71 : vector<128x9xf32>
    %c0_79 = arith.constant 0 : index
    %c2_80 = arith.constant 2 : index
    %c0_81 = arith.constant 0 : index
    %c5_82 = arith.constant 5 : index
    %73 = vector.load %arg2[%c0_79, %c2_80, %c0_81, %c5_82] : memref<1x18x9x10xf32, #tpu.memory_space<vmem>>, vector<1x16x8x5xf32>
    %74 = vector.shape_cast %73 : vector<1x16x8x5xf32> to vector<16x8x5xf32>
    %c0_83 = arith.constant 0 : index
    %c2_84 = arith.constant 2 : index
    %c1_85 = arith.constant 1 : index
    %c0_86 = arith.constant 0 : index
    %75 = vector.load %arg2[%c0_83, %c2_84, %c1_85, %c0_86] : memref<1x18x9x10xf32, #tpu.memory_space<vmem>>, vector<1x16x8x5xf32>
    %76 = vector.shape_cast %75 : vector<1x16x8x5xf32> to vector<16x8x5xf32>
    %c0_87 = arith.constant 0 : index
    %c2_88 = arith.constant 2 : index
    %c1_89 = arith.constant 1 : index
    %c5_90 = arith.constant 5 : index
    %77 = vector.load %arg2[%c0_87, %c2_88, %c1_89, %c5_90] : memref<1x18x9x10xf32, #tpu.memory_space<vmem>>, vector<1x16x8x5xf32>
    %78 = vector.shape_cast %77 : vector<1x16x8x5xf32> to vector<16x8x5xf32>
    %79 = tpu.concatenate %74, %76, %78 in 2 : vector<16x8x5xf32>, vector<16x8x5xf32>, vector<16x8x5xf32> -> vector<16x8x15xf32>
    %80 = vector.shape_cast %79 : vector<16x8x15xf32> to vector<128x15xf32>
    %c2_91 = arith.constant 2 : index
    %c0_92 = arith.constant 0 : index
    %c0_93 = arith.constant 0 : index
    %81 = vector.load %arg3[%c2_91, %c0_92, %c0_93] : memref<3x15x9xf32, #tpu.memory_space<vmem>>, vector<1x15x9xf32>
    %82 = vector.shape_cast %81 : vector<1x15x9xf32> to vector<15x9xf32>
    %cst_94 = arith.constant dense<0.000000e+00> : vector<128x9xf32>
    %83 = tpu.matmul %80, %82, %cst_94 {dimension_numbers = #tpu.dot_dimension_numbers<[1], [0], [0], [1], [0, 0, 1, 1], [], []>} : vector<128x15xf32>, vector<15x9xf32>, vector<128x9xf32> -> vector<128x9xf32>
    %84 = arith.addf %72, %83 : vector<128x9xf32>
    %85 = vector.extract_strided_slice %84 {offsets = [0, 8], sizes = [128, 1], strides = [1, 1]} : vector<128x9xf32> to vector<128x1xf32>
    %cst_95 = arith.constant 0.000000e+00 : f32
    %cst_96 = arith.constant 1.000000e+00 : f32
    %86 = vector.broadcast %cst_95 : f32 to vector<128x1xf32>
    %87 = arith.maximumf %86, %85 : vector<128x1xf32>
    %88 = vector.broadcast %cst_96 : f32 to vector<128x1xf32>
    %89 = arith.minimumf %88, %87 : vector<128x1xf32>
    %cst_97 = arith.constant 9.99999993E-9 : f32
    %90 = vector.broadcast %cst_97 : f32 to vector<128x1xf32>
    %91 = arith.addf %85, %90 : vector<128x1xf32>
    %92 = tpu.reciprocal %91 {approx = true} : vector<128x1xf32> -> vector<128x1xf32>
    %cst_98 = arith.constant 9.000000e+00 : f32
    %93 = vector.broadcast %cst_98 : f32 to vector<128x1xf32>
    %94 = arith.mulf %93, %92 : vector<128x1xf32>
    %95 = arith.mulf %94, %89 : vector<128x1xf32>
    %96 = vector.extract_strided_slice %84 {offsets = [0, 0], sizes = [128, 8], strides = [1, 1]} : vector<128x9xf32> to vector<128x8xf32>
    %97 = vector.broadcast %95 : vector<128x1xf32> to vector<128x8xf32>
    %98 = arith.mulf %96, %97 : vector<128x8xf32>
    %99 = tpu.concatenate %98, %89 in 1 : vector<128x8xf32>, vector<128x1xf32> -> vector<128x9xf32>
    %100 = arith.maximumf %49, %99 : vector<128x9xf32>
    %101 = vector.shape_cast %100 : vector<128x9xf32> to vector<8x16x9xf32>
    %102 = vector.extract_strided_slice %101 {offsets = [0, 0, 0], sizes = [8, 8, 9], strides = [1, 1, 1]} : vector<8x16x9xf32> to vector<8x8x9xf32>
    %103 = vector.extract_strided_slice %101 {offsets = [0, 8, 0], sizes = [8, 8, 9], strides = [1, 1, 1]} : vector<8x16x9xf32> to vector<8x8x9xf32>
    %104 = arith.maximumf %102, %103 : vector<8x8x9xf32>
    %105 = vector.shape_cast %104 : vector<8x8x9xf32> to vector<64x9xf32>
    %cst_99 = arith.constant 0.000000e+00 : f32
    %106 = vector.broadcast %cst_99 : f32 to vector<64x9xf32>
    %107 = arith.cmpf oge, %105, %106 : vector<64x9xf32>
    %cst_100 = arith.constant 1.000000e-01 : f32
    %108 = vector.broadcast %cst_100 : f32 to vector<64x9xf32>
    %109 = arith.mulf %108, %105 : vector<64x9xf32>
    %110 = arith.select %107, %105, %109 : vector<64x9xi1>, vector<64x9xf32>
    %cst_101 = arith.constant 0.000000e+00 : f32
    %111 = vector.broadcast %cst_101 : f32 to vector<64x119xf32>
    %112 = tpu.concatenate %110, %111 in 1 : vector<64x9xf32>, vector<64x119xf32> -> vector<64x128xf32>
    %113 = tpu.transpose %112, [1, 0] : vector<64x128xf32> -> vector<128x64xf32>
    %114 = vector.extract_strided_slice %113 {offsets = [0, 0], sizes = [9, 64], strides = [1, 1]} : vector<128x64xf32> to vector<9x64xf32>
    %c0_102 = arith.constant 0 : index
    %c0_103 = arith.constant 0 : index
    %c0_104 = arith.constant 0 : index
    %115 = vector.load %arg4[%c0_102, %c0_103, %c0_104] : memref<1x9x64xf32, #tpu.memory_space<vmem>>, vector<1x9x64xf32>
    %116 = vector.shape_cast %115 : vector<1x9x64xf32> to vector<9x64xf32>
    %117 = vector.shape_cast %114 : vector<9x64xf32> to vector<1x9x64xf32>
    tpu.vector_store %arg4[%c0_102, %c0_103, %c0_104], %117 {strides = array<i32>} : memref<1x9x64xf32, #tpu.memory_space<vmem>>, vector<1x9x64xf32>,
    return
  }
  func.func @transform_0(%arg0: i32, %arg1: i32) -> (i32, i32, i32, i32) {
    %c1_i32 = arith.constant 1 : i32
    %0 = arith.muli %arg0, %c1_i32 : i32
    %1 = arith.addi %0, %arg1 : i32
    %c0_i32 = arith.constant 0 : i32
    %c0_i32_0 = arith.constant 0 : i32
    %c0_i32_1 = arith.constant 0 : i32
    %c0_i32_2 = arith.constant 0 : i32
    return %1, %c0_i32, %c0_i32_0, %c0_i32_1 : i32, i32, i32, i32
  }
  func.func @transform_1(%arg0: i32, %arg1: i32) -> (i32, i32, i32) {
    %c0_i32 = arith.constant 0 : i32
    %c0_i32_0 = arith.constant 0 : i32
    %c0_i32_1 = arith.constant 0 : i32
    %c0_i32_2 = arith.constant 0 : i32
    return %c0_i32, %c0_i32_0, %c0_i32_1 : i32, i32, i32
  }
  func.func @transform_2(%arg0: i32, %arg1: i32) -> (i32, i32, i32) {
    %c0_i32 = arith.constant 0 : i32
    %c0_i32_0 = arith.constant 0 : i32
    return %arg0, %c0_i32, %arg1 : i32, i32, i32
  }
}

</mosaic_0001>

<bundles_post_ra>
// kernel: encoder_forward.1
= control target key start
LH: loop header
LB: loop body
LE: loop exit
PB: predicated region body
PF: predicated region fallthrough
CT: control target
= control target key end

     0   :  { %s3437_s9 = smov 0   ;;  %s3439_s10 = smov 0   ;;  %s4532_s0 = inlined_call_operand.vmem [shape: f32[2,18,9,10], index: 0, kind: input, shape index: {}]   ;;  %s4533_s1 = inlined_call_operand.vmem [shape: f32[3,15,9], index: 1, kind: input, shape index: {}]   ;;  %s4534_s2 = inlined_call_operand.vmem [shape: f32[2,9,64], index: 2, kind: output, shape index: {}]  }
   0x1   :  { %s3441_s11 = smov 0  }
   0x2 LB: > { %s24_s12 = sadd.s32 1, %s3411_s10  ;;  %p2743_p0 = scmp.ge.s32.totalorder %s3415_s11, 1  ;;  %s3415_s11 = sphi %s3441_s11, %s12_s11   ;;  %s3411_s10 = sphi %s3439_s10, %s4580_s10   ;;  %s3407_s9 = sphi %s3437_s9, %s4579_s9  }
   0x3   : > { %p26_p1 = scmp.ge.s32.totalorder %s24_s12, 2  ;;  %p130_p2 = scmp.lt.s32.totalorder %s3415_s11, 3 }
   0x5   : > { %s4582_s12 = smov (%p26_p1, %s24_s12), 0  ;;  %p131_p3 = pnand %p2743_p0, %p130_p2 }
   0x7   : > { %134 = sbr.rel (%p131_p3) target bundleno = 900 (0x384), region = 28 }
   0xe   : > { %p157_p4 = scmp.lt.s32.totalorder %s3407_s9, 1  ;;  %v2779_v0 = vld [vmem:[%s4533_s1 + $0x10] sm:$0xff]  ;;  %vm452_vm0 = vcmask 1046528   ;;  %v2780_v1 = vld [vmem:[%s4533_s1 + $0x18] sm:$0x7f]  ;;  %vm3417_vm1 = vmmov 1  }
   0xf   : > { %v3196_v2 = vpack.c.bf16 %v2780_v1, %v2779_v0  ;;  %vm3463_vm2 = vmpackc.low %vm452_vm0, %vm3417_vm1  ;;  %s3418_s21 = smov 10   ;;  %s3419_s22 = smov 123   ;;  %v285_v35 = vld [vmem:[%s4533_s1] sm:$0xff]  ;;  %v286_v36 = vld [vmem:[%s4533_s1 + $0x8] sm:$0x7f]  ;;  %vm268_vm3 = vcmask 80896  }
  0x10   : > { %s4584_s9 = smov (!%p157_p4, %s3407_s9), 1  ;;  %s3420_s23 = smov 5   ;;  %v3202_v37 = vpack.c.bf16 %v286_v36, %v285_v35  ;;  %vm403_vm4 = vcmask 121856   ;;  %vm267_vm5 = vcmask 39936   ;;  %vm1317_vm6 = vcmask 64512  }
  0x11   : > { %s3296_s17 = smul.u32 288, %s4584_s9  ;;  %3198 = vmatprep.subr.msk.bf16.mxu0 %vm3463_vm2, %v3196_v2  ;;  %3216 = vmatprep.subr.msk.bf16.mxu1 %vm3463_vm2, %v3196_v2  ;;  %vm2617_vm8 = vcmask 72704   ;;  %s2919_s4 = sshll.u32 %s4584_s9, 4  ;;  %vm2658_vm0 = vcmask 523264   ;;  %vm2660_vm1 = vcmask 516096  }
  0x12   : > { %3201 = vmatpush3.bf16.msk.msra.mxu0 %vm3463_vm2, %v3196_v2  ;;  %3219 = vmatpush3.bf16.msk.msra.mxu1 %vm3463_vm2, %v3196_v2  ;;  %s170_s7 = scalar_lea.vmem %s4534_s2, %s2919_s4 }
  0x13   : > { %s3479_s20 = scalar_lea.vmem %s4532_s0, %s3296_s17  ;;  %3204 = vmatprep.subr.msk.bf16.mxu0 %vm3463_vm2, %v3202_v37  ;;  %3222 = vmatprep.subr.msk.bf16.mxu1 %vm3463_vm2, %v3202_v37 }
  0x14   : > { %v3482_v4 = vld [vmem:[%s3479_s20 + $0x11] sm:$0xff]  ;;  %v3492_v6 = vld [vmem:[%s3479_s20 + $0x20] sm:$0xff] }
  0x15   : > { %v3485_v5 = vld [vmem:[%s3479_s20 + $0x10] sm:$0xff]  ;;  %336 = vrot.lane.b32.xlu1 %v3482_v4, %s3418_s21  ;;  %v3499_v7 = vld [vmem:[%s3479_s20 + $0x21] sm:$0xff] }
  0x16   : > { %1494 = vrot.lane.b32.xlu0 %v3485_v5, %s3419_s22  ;;  %v3506_v8 = vld [vmem:[%s3479_s20 + $0x31] sm:$0xff]  ;;  %v3516_v10 = vld [vmem:[%s3479_s20 + $0x40] sm:$0xff] }
  0x17   : > { %v3509_v9 = vld [vmem:[%s3479_s20 + $0x30] sm:$0xff]  ;;  %v3523_v11 = vld [vmem:[%s3479_s20 + $0x41] sm:$0xff] }
  0x18   : > { %v3530_v12 = vld [vmem:[%s3479_s20 + $0x51] sm:$0xff]  ;;  %v3540_v14 = vld [vmem:[%s3479_s20 + $0x60] sm:$0xff] }
  0x19   : > { %1496 = vrot.lane.b32.xlu1 %v3492_v6, %s3419_s22  ;;  %v3533_v13 = vld [vmem:[%s3479_s20 + $0x50] sm:$0xff]  ;;  %v3547_v15 = vld [vmem:[%s3479_s20 + $0x61] sm:$0xff] }
  0x1a   : > { %1542 = vrot.lane.b32.xlu0 %v3482_v4, %s3420_s23  ;;  %v3554_v16 = vld [vmem:[%s3479_s20 + $0x71] sm:$0xff]  ;;  %v3564_v18 = vld [vmem:[%s3479_s20 + $0x80] sm:$0xff] }
  0x1b   : > { %v3557_v17 = vld [vmem:[%s3479_s20 + $0x70] sm:$0xff]  ;;  %v3571_v19 = vld [vmem:[%s3479_s20 + $0x81] sm:$0xff] }
  0x1c   : > { %v3578_v20 = vld [vmem:[%s3479_s20 + $0x91] sm:$0xff]  ;;  %v3588_v22 = vld [vmem:[%s3479_s20 + $0xa0] sm:$0xff] }
  0x1d   : > { %338 = vrot.lane.b32.xlu1 %v3499_v7, %s3418_s21  ;;  %v3581_v21 = vld [vmem:[%s3479_s20 + $0x90] sm:$0xff]  ;;  %v3595_v23 = vld [vmem:[%s3479_s20 + $0xa1] sm:$0xff] }
  0x1e   : > { %1544 = vrot.lane.b32.xlu0 %v3499_v7, %s3420_s23  ;;  %v3602_v24 = vld [vmem:[%s3479_s20 + $0xb1] sm:$0xff]  ;;  %v3612_v26 = vld [vmem:[%s3479_s20 + $0xc0] sm:$0xff] }
  0x1f   : > { %v3605_v25 = vld [vmem:[%s3479_s20 + $0xb0] sm:$0xff]  ;;  %v3619_v27 = vld [vmem:[%s3479_s20 + $0xc1] sm:$0xff] }
  0x20   : > { %v3626_v28 = vld [vmem:[%s3479_s20 + $0xd1] sm:$0xff]  ;;  %v3636_v30 = vld [vmem:[%s3479_s20 + $0xe0] sm:$0xff] }
  0x21   : > { %1546 = vrot.lane.b32.xlu1 %v3506_v8, %s3420_s23  ;;  %v3629_v29 = vld [vmem:[%s3479_s20 + $0xd0] sm:$0xff]  ;;  %v3643_v31 = vld [vmem:[%s3479_s20 + $0xe1] sm:$0xff] }
  0x22   : > { %1498 = vrot.lane.b32.xlu0 %v3509_v9, %s3419_s22  ;;  %v3650_v32 = vld [vmem:[%s3479_s20 + $0xf1] sm:$0xff]  ;;  %v3660_v34 = vld [vmem:[%s3479_s20 + $0x100] sm:$0xff] }
  0x23   : > { %v3653_v33 = vld [vmem:[%s3479_s20 + $0xf0] sm:$0xff]  ;;  %v3673_v38 = vld [vmem:[%s3479_s20 + $0x101] sm:$0xff] }
  0x24   : > { %v187_v39 = vld [vmem:[%s3479_s20 + $0x1] sm:$0xff] }
  0x25   : > { %1500 = vrot.lane.b32.xlu1 %v3516_v10, %s3419_s22  ;;  %v3685_v40 = vld [vmem:[%s3479_s20] sm:$0xff] }
  0x26   : > { %340 = vrot.lane.b32.xlu0 %v3506_v8, %s3418_s21 }
  0x29   : > { %342 = vrot.lane.b32.xlu1 %v3523_v11, %s3418_s21 }
  0x2a   : > { %1548 = vrot.lane.b32.xlu0 %v3523_v11, %s3420_s23 }
  0x2d   : > { %1550 = vrot.lane.b32.xlu1 %v3530_v12, %s3420_s23 }
  0x2e   : > { %1502 = vrot.lane.b32.xlu0 %v3533_v13, %s3419_s22 }
  0x31   : > { %1504 = vrot.lane.b32.xlu1 %v3540_v14, %s3419_s22 }
  0x32   : > { %344 = vrot.lane.b32.xlu0 %v3530_v12, %s3418_s21 }
  0x35   : > { %346 = vrot.lane.b32.xlu1 %v3547_v15, %s3418_s21 }
  0x36   : > { %1552 = vrot.lane.b32.xlu0 %v3547_v15, %s3420_s23 }
  0x39   : > { %1554 = vrot.lane.b32.xlu1 %v3554_v16, %s3420_s23 }
  0x3a   : > { %1506 = vrot.lane.b32.xlu0 %v3557_v17, %s3419_s22 }
  0x3d   : > { %1508 = vrot.lane.b32.xlu1 %v3564_v18, %s3419_s22 }
  0x3e   : > { %348 = vrot.lane.b32.xlu0 %v3554_v16, %s3418_s21 }
  0x41   : > { %350 = vrot.lane.b32.xlu1 %v3571_v19, %s3418_s21 }
  0x42   : > { %1556 = vrot.lane.b32.xlu0 %v3571_v19, %s3420_s23 }
  0x45   : > { %1558 = vrot.lane.b32.xlu1 %v3578_v20, %s3420_s23 }
  0x46   : > { %1510 = vrot.lane.b32.xlu0 %v3581_v21, %s3419_s22 }
  0x49   : > { %1512 = vrot.lane.b32.xlu1 %v3588_v22, %s3419_s22 }
  0x4a   : > { %352 = vrot.lane.b32.xlu0 %v3578_v20, %s3418_s21 }
  0x4d   : > { %354 = vrot.lane.b32.xlu1 %v3595_v23, %s3418_s21 }
  0x4e   : > { %1560 = vrot.lane.b32.xlu0 %v3595_v23, %s3420_s23 }
  0x51   : > { %1562 = vrot.lane.b32.xlu1 %v3602_v24, %s3420_s23 }
  0x52   : > { %1514 = vrot.lane.b32.xlu0 %v3605_v25, %s3419_s22 }
  0x55   : > { %1516 = vrot.lane.b32.xlu1 %v3612_v26, %s3419_s22 }
  0x56   : > { %356 = vrot.lane.b32.xlu0 %v3602_v24, %s3418_s21 }
  0x59   : > { %358 = vrot.lane.b32.xlu1 %v3619_v27, %s3418_s21 }
  0x5a   : > { %1564 = vrot.lane.b32.xlu0 %v3619_v27, %s3420_s23 }
  0x5d   : > { %1566 = vrot.lane.b32.xlu1 %v3626_v28, %s3420_s23 }
  0x5e   : > { %1518 = vrot.lane.b32.xlu0 %v3629_v29, %s3419_s22 }
  0x61   : > { %1520 = vrot.lane.b32.xlu1 %v3636_v30, %s3419_s22 }
  0x62   : > { %360 = vrot.lane.b32.xlu0 %v3626_v28, %s3418_s21 }
  0x65   : > { %362 = vrot.lane.b32.xlu1 %v3643_v31, %s3418_s21 }
  0x66   : > { %1568 = vrot.lane.b32.xlu0 %v3643_v31, %s3420_s23 }
  0x69   : > { %1570 = vrot.lane.b32.xlu1 %v3650_v32, %s3420_s23 }
  0x6a   : > { %1522 = vrot.lane.b32.xlu0 %v3653_v33, %s3419_s22 }
  0x6d   : > { %1524 = vrot.lane.b32.xlu1 %v3660_v34, %s3419_s22 }
  0x6e   : > { %364 = vrot.lane.b32.xlu0 %v3650_v32, %s3418_s21 }
  0x71   : > { %366 = vrot.lane.b32.xlu1 %v3673_v38, %s3418_s21 }
  0x72   : > { %1572 = vrot.lane.b32.xlu0 %v3673_v38, %s3420_s23 }
  0x75   : > { %1398 = vrot.lane.b32.xlu1 %v187_v39, %s3420_s23 }
  0x76   : > { %1350 = vrot.lane.b32.xlu0 %v3685_v40, %s3419_s22 }
  0x79   : > { %1352 = vrot.lane.b32.xlu1 %v3485_v5, %s3419_s22 }
  0x7a   : > { %219 = vrot.lane.b32.xlu0 %v187_v39, %s3418_s21 }
  0x7d   : > { %221 = vrot.lane.b32.xlu1 %v3482_v4, %s3418_s21 }
  0x7e   : > { %1400 = vrot.lane.b32.xlu0 %v3482_v4, %s3420_s23 }
  0x81   : > { %1402 = vrot.lane.b32.xlu1 %v3499_v7, %s3420_s23 }
  0x82   : > { %1354 = vrot.lane.b32.xlu0 %v3492_v6, %s3419_s22 }
  0x85   : > { %1356 = vrot.lane.b32.xlu1 %v3509_v9, %s3419_s22 }
  0x86   : > { %223 = vrot.lane.b32.xlu0 %v3499_v7, %s3418_s21 }
  0x87   : > { %v337_v41 = vpop.permute.xlu1 %336 }
  0x88   : > { %v1495_v42 = vpop.permute.xlu0 %1494  ;;  %v384_v43 = vsel %vm268_vm3, %v3485_v5, %v337_v41 }
  0x89   : > { %3032 = vmatprep.mubr.msk.f32.mxu0 %vm403_vm4, %v384_v43  ;;  %225 = vrot.lane.b32.xlu1 %v3506_v8, %s3418_s21 }
  0x8a   : > { %1404 = vrot.lane.b32.xlu0 %v3506_v8, %s3420_s23 }
  0x8b   : > { %v1497_v44 = vpop.permute.xlu1 %1496 }
  0x8c   : > { %v1543_v45 = vpop.permute.xlu0 %1542 }
  0x8d   : > { %v1590_v46 = vsel %vm267_vm5, %v1495_v42, %v1543_v45  ;;  %1406 = vrot.lane.b32.xlu1 %v3523_v11, %s3420_s23 }
  0x8e   : > { %v1606_v47 = vsel %vm268_vm3, %v1590_v46, %v1543_v45  ;;  %1358 = vrot.lane.b32.xlu0 %v3516_v10, %s3419_s22 }
  0x8f   : > { %3116 = vmatprep.mubr.msk.f32.mxu1 %vm403_vm4, %v1606_v47  ;;  %v339_v48 = vpop.permute.xlu1 %338 }
  0x90   : > { %v1545_v49 = vpop.permute.xlu0 %1544  ;;  %v385_v50 = vsel %vm268_vm3, %v3492_v6, %v339_v48 }
  0x91   : > { %v1591_v51 = vsel %vm267_vm5, %v1497_v44, %v1545_v49  ;;  %3033 = vmatmul.mubr.msk.f32.vlgmr.msra.gmra.mrb[0].mxu0 %vm403_vm4, %v385_v50  ;;  %1360 = vrot.lane.b32.xlu1 %v3533_v13, %s3419_s22 }
  0x92   : > { %v1607_v52 = vsel %vm268_vm3, %v1591_v51, %v1545_v49  ;;  %227 = vrot.lane.b32.xlu0 %v3523_v11, %s3418_s21  ;;  %3207 = vmatpush3.bf16.msk.msra.mxu0 %vm3463_vm2, %v3202_v37 }
  0x93   : > { %3117 = vmatmul.mubr.msk.f32.vlgmr.msra.gmra.mrb[0].mxu1 %vm403_vm4, %v1607_v52  ;;  %v1547_v53 = vpop.permute.xlu1 %1546 }
  0x94   : > { %v1499_v54 = vpop.permute.xlu0 %1498  ;;  %3225 = vmatpush3.bf16.msk.msra.mxu1 %vm3463_vm2, %v3202_v37 }
  0x95   : > { %v1592_v55 = vsel %vm267_vm5, %v1499_v54, %v1547_v53  ;;  %229 = vrot.lane.b32.xlu1 %v3530_v12, %s3418_s21 }
  0x96   : > { %v1608_v56 = vsel %vm268_vm3, %v1592_v55, %v1547_v53  ;;  %1408 = vrot.lane.b32.xlu0 %v3530_v12, %s3420_s23 }
  0x97   : > { %3119 = vmatprep.mubr.msk.f32.mxu1 %vm403_vm4, %v1608_v56  ;;  %v1501_v57 = vpop.permute.xlu1 %1500 }
  0x98   : > { %v341_v58 = vpop.permute.xlu0 %340 }
  0x99   : > { %v386_v59 = vsel %vm268_vm3, %v3509_v9, %v341_v58  ;;  %1410 = vrot.lane.b32.xlu1 %v3547_v15, %s3420_s23 }
  0x9a   : > { %3035 = vmatprep.mubr.msk.f32.mxu0 %vm403_vm4, %v386_v59  ;;  %1362 = vrot.lane.b32.xlu0 %v3540_v14, %s3419_s22 }
  0x9b   : > { %v343_v60 = vpop.permute.xlu1 %342 }
  0x9c   : > { %v1549_v61 = vpop.permute.xlu0 %1548  ;;  %v387_v62 = vsel %vm268_vm3, %v3516_v10, %v343_v60 }
  0x9d   : > { %v1593_v63 = vsel %vm267_vm5, %v1501_v57, %v1549_v61  ;;  %3036 = vmatmul.mubr.msk.f32.gmra.mrb[2].mxu0 %vm403_vm4, %v387_v62  ;;  %1364 = vrot.lane.b32.xlu1 %v3557_v17, %s3419_s22 }
  0x9e   : > { %v1609_v0 = vsel %vm268_vm3, %v1593_v63, %v1549_v61  ;;  %231 = vrot.lane.b32.xlu0 %v3547_v15, %s3418_s21 }
  0x9f   : > { %3120 = vmatmul.mubr.msk.f32.gmra.mrb[2].mxu1 %vm403_vm4, %v1609_v0  ;;  %v1551_v1 = vpop.permute.xlu1 %1550 }
  0xa0   : > { %v1503_v2 = vpop.permute.xlu0 %1502 }
  0xa1   : > { %v1594_v4 = vsel %vm267_vm5, %v1503_v2, %v1551_v1  ;;  %233 = vrot.lane.b32.xlu1 %v3554_v16, %s3418_s21 }
  0xa2   : > { %v1610_v35 = vsel %vm268_vm3, %v1594_v4, %v1551_v1  ;;  %1412 = vrot.lane.b32.xlu0 %v3554_v16, %s3420_s23 }
  0xa3   : > { %3122 = vmatprep.mubr.msk.f32.mxu1 %vm403_vm4, %v1610_v35  ;;  %v1505_v36 = vpop.permute.xlu1 %1504 }
  0xa4   : > { %v345_v37 = vpop.permute.xlu0 %344 }
  0xa5   : > { %v388_v39 = vsel %vm268_vm3, %v3533_v13, %v345_v37  ;;  %1414 = vrot.lane.b32.xlu1 %v3571_v19, %s3420_s23 }
  0xa6   : > { %3038 = vmatprep.mubr.msk.f32.mxu0 %vm403_vm4, %v388_v39  ;;  %1366 = vrot.lane.b32.xlu0 %v3564_v18, %s3419_s22 }
  0xa7   : > { %v347_v41 = vpop.permute.xlu1 %346 }
  0xa8   : > { %v1553_v42 = vpop.permute.xlu0 %1552  ;;  %v389_v43 = vsel %vm268_vm3, %v3540_v14, %v347_v41 }
  0xa9   : > { %v1595_v44 = vsel %vm267_vm5, %v1505_v36, %v1553_v42  ;;  %3039 = vmatmul.mubr.msk.f32.gmra.mrb[4].mxu0 %vm403_vm4, %v389_v43  ;;  %1368 = vrot.lane.b32.xlu1 %v3581_v21, %s3419_s22 }
  0xaa   : > { %v1611_v45 = vsel %vm268_vm3, %v1595_v44, %v1553_v42  ;;  %235 = vrot.lane.b32.xlu0 %v3571_v19, %s3418_s21 }
  0xab   : > { %3123 = vmatmul.mubr.msk.f32.gmra.mrb[4].mxu1 %vm403_vm4, %v1611_v45  ;;  %v1555_v46 = vpop.permute.xlu1 %1554 }
  0xac   : > { %v1507_v47 = vpop.permute.xlu0 %1506 }
  0xad   : > { %v1596_v48 = vsel %vm267_vm5, %v1507_v47, %v1555_v46  ;;  %237 = vrot.lane.b32.xlu1 %v3578_v20, %s3418_s21 }
  0xae   : > { %v1612_v49 = vsel %vm268_vm3, %v1596_v48, %v1555_v46  ;;  %1416 = vrot.lane.b32.xlu0 %v3578_v20, %s3420_s23  ;;  %v2847_v48 = vld [vmem:[%s4533_s1 + $0x20] sm:$0xff] }
  0xaf   : > { %3125 = vmatprep.mubr.msk.f32.mxu1 %vm403_vm4, %v1612_v49  ;;  %v1509_v50 = vpop.permute.xlu1 %1508  ;;  %v2848_v49 = vld [vmem:[%s4533_s1 + $0x28] sm:$0x7f] }
  0xb0   : > { %v349_v51 = vpop.permute.xlu0 %348 }
  0xb1   : > { %v390_v52 = vsel %vm268_vm3, %v3557_v17, %v349_v51  ;;  %1418 = vrot.lane.b32.xlu1 %v3595_v23, %s3420_s23 }
  0xb2   : > { %3041 = vmatprep.mubr.msk.f32.mxu0 %vm403_vm4, %v390_v52  ;;  %1370 = vrot.lane.b32.xlu0 %v3588_v22, %s3419_s22  ;;  %v3852_v52 = vpack.c.bf16 %v2848_v49, %v2847_v48 }
  0xb3   : > { %v351_v53 = vpop.permute.xlu1 %350 }
  0xb4   : > { %v1557_v54 = vpop.permute.xlu0 %1556  ;;  %v391_v55 = vsel %vm268_vm3, %v3564_v18, %v351_v53  ;;  %3210 = vmatprep.subr.msk.bf16.mxu0 %vm3463_vm2, %v3852_v52  ;;  %3228 = vmatprep.subr.msk.bf16.mxu1 %vm3463_vm2, %v3852_v52 }
  0xb5   : > { %v1597_v56 = vsel %vm267_vm5, %v1509_v50, %v1557_v54  ;;  %3042 = vmatmul.mubr.msk.f32.gmra.mrb[6].mxu0 %vm403_vm4, %v391_v55  ;;  %1372 = vrot.lane.b32.xlu1 %v3605_v25, %s3419_s22 }
  0xb6   : > { %v1613_v57 = vsel %vm268_vm3, %v1597_v56, %v1557_v54  ;;  %239 = vrot.lane.b32.xlu0 %v3595_v23, %s3418_s21 }
  0xb7   : > { %3126 = vmatmul.mubr.msk.f32.gmra.mrb[6].mxu1 %vm403_vm4, %v1613_v57  ;;  %v1559_v58 = vpop.permute.xlu1 %1558 }
  0xb8   : > { %v1511_v59 = vpop.permute.xlu0 %1510 }
  0xb9   : > { %v1598_v60 = vsel %vm267_vm5, %v1511_v59, %v1559_v58  ;;  %241 = vrot.lane.b32.xlu1 %v3602_v24, %s3418_s21 }
  0xba   : > { %v1614_v61 = vsel %vm268_vm3, %v1598_v60, %v1559_v58  ;;  %1420 = vrot.lane.b32.xlu0 %v3602_v24, %s3420_s23 }
  0xbb   : > { %3128 = vmatprep.mubr.msk.f32.mxu1 %vm403_vm4, %v1614_v61  ;;  %v1513_v62 = vpop.permute.xlu1 %1512 }
  0xbc   : > { %v353_v63 = vpop.permute.xlu0 %352 }
  0xbd   : > { %v392_v0 = vsel %vm268_vm3, %v3581_v21, %v353_v63  ;;  %1422 = vrot.lane.b32.xlu1 %v3619_v27, %s3420_s23 }
  0xbe   : > { %3044 = vmatprep.mubr.msk.f32.mxu0 %vm403_vm4, %v392_v0  ;;  %1374 = vrot.lane.b32.xlu0 %v3612_v26, %s3419_s22 }
  0xbf   : > { %v355_v1 = vpop.permute.xlu1 %354 }
  0xc0   : > { %v1561_v2 = vpop.permute.xlu0 %1560  ;;  %v393_v4 = vsel %vm268_vm3, %v3588_v22, %v355_v1 }
  0xc1   : > { %v1599_v35 = vsel %vm267_vm5, %v1513_v62, %v1561_v2  ;;  %3045 = vmatmul.mubr.msk.f32.gmra.mrb[8].mxu0 %vm403_vm4, %v393_v4  ;;  %1376 = vrot.lane.b32.xlu1 %v3629_v29, %s3419_s22 }
  0xc2   : > { %v1615_v36 = vsel %vm268_vm3, %v1599_v35, %v1561_v2  ;;  %243 = vrot.lane.b32.xlu0 %v3619_v27, %s3418_s21 }
  0xc3   : > { %3129 = vmatmul.mubr.msk.f32.gmra.mrb[8].mxu1 %vm403_vm4, %v1615_v36  ;;  %v1563_v37 = vpop.permute.xlu1 %1562 }
  0xc4   : > { %v1515_v39 = vpop.permute.xlu0 %1514 }
  0xc5   : > { %v1600_v41 = vsel %vm267_vm5, %v1515_v39, %v1563_v37  ;;  %245 = vrot.lane.b32.xlu1 %v3626_v28, %s3418_s21 }
  0xc6   : > { %v1616_v42 = vsel %vm268_vm3, %v1600_v41, %v1563_v37  ;;  %1424 = vrot.lane.b32.xlu0 %v3626_v28, %s3420_s23 }
  0xc7   : > { %3131 = vmatprep.mubr.msk.f32.mxu1 %vm403_vm4, %v1616_v42  ;;  %v1517_v43 = vpop.permute.xlu1 %1516 }
  0xc8   : > { %v357_v44 = vpop.permute.xlu0 %356 }
  0xc9   : > { %v394_v45 = vsel %vm268_vm3, %v3605_v25, %v357_v44  ;;  %1426 = vrot.lane.b32.xlu1 %v3643_v31, %s3420_s23 }
  0xca   : > { %3047 = vmatprep.mubr.msk.f32.mxu0 %vm403_vm4, %v394_v45  ;;  %1378 = vrot.lane.b32.xlu0 %v3636_v30, %s3419_s22 }
  0xcb   : > { %v359_v46 = vpop.permute.xlu1 %358 }
  0xcc   : > { %v1565_v47 = vpop.permute.xlu0 %1564  ;;  %v395_v50 = vsel %vm268_vm3, %v3612_v26, %v359_v46 }
  0xcd   : > { %v1601_v51 = vsel %vm267_vm5, %v1517_v43, %v1565_v47  ;;  %3048 = vmatmul.mubr.msk.f32.gmra.mrb[10].mxu0 %vm403_vm4, %v395_v50  ;;  %1380 = vrot.lane.b32.xlu1 %v3653_v33, %s3419_s22 }
  0xce   : > { %v1617_v53 = vsel %vm268_vm3, %v1601_v51, %v1565_v47  ;;  %247 = vrot.lane.b32.xlu0 %v3643_v31, %s3418_s21 }
  0xcf   : > { %3132 = vmatmul.mubr.msk.f32.gmra.mrb[10].mxu1 %vm403_vm4, %v1617_v53  ;;  %v1567_v54 = vpop.permute.xlu1 %1566 }
  0xd0   : > { %v1519_v55 = vpop.permute.xlu0 %1518 }
  0xd1   : > { %v1602_v56 = vsel %vm267_vm5, %v1519_v55, %v1567_v54  ;;  %249 = vrot.lane.b32.xlu1 %v3650_v32, %s3418_s21 }
  0xd2   : > { %v1618_v57 = vsel %vm268_vm3, %v1602_v56, %v1567_v54  ;;  %1428 = vrot.lane.b32.xlu0 %v3650_v32, %s3420_s23 }
  0xd3   : > { %3134 = vmatprep.mubr.msk.f32.mxu1 %vm403_vm4, %v1618_v57  ;;  %v1521_v58 = vpop.permute.xlu1 %1520 }
  0xd4   : > { %v361_v59 = vpop.permute.xlu0 %360 }
  0xd5   : > { %v396_v60 = vsel %vm268_vm3, %v3629_v29, %v361_v59  ;;  %2072 = vrot.lane.b32.xlu1 %v3499_v7, %s3420_s23 }
  0xd6   : > { %3050 = vmatprep.mubr.msk.f32.mxu0 %vm403_vm4, %v396_v60  ;;  %2024 = vrot.lane.b32.xlu0 %v3492_v6, %s3419_s22 }
  0xd7   : > { %v363_v61 = vpop.permute.xlu1 %362 }
  0xd8   : > { %v1569_v62 = vpop.permute.xlu0 %1568  ;;  %v397_v63 = vsel %vm268_vm3, %v3636_v30, %v363_v61 }
  0xd9   : > { %v1603_v0 = vsel %vm267_vm5, %v1521_v58, %v1569_v62  ;;  %3051 = vmatmul.mubr.msk.f32.gmra.mrb[12].mxu0 %vm403_vm4, %v397_v63  ;;  %2026 = vrot.lane.b32.xlu1 %v3509_v9, %s3419_s22 }
  0xda   : > { %v1619_v1 = vsel %vm268_vm3, %v1603_v0, %v1569_v62  ;;  %846 = vrot.lane.b32.xlu0 %v3499_v7, %s3418_s21 }
  0xdb   : > { %3135 = vmatmul.mubr.msk.f32.gmra.mrb[12].mxu1 %vm403_vm4, %v1619_v1  ;;  %v1571_v2 = vpop.permute.xlu1 %1570 }
  0xdc   : > { %v1523_v4 = vpop.permute.xlu0 %1522 }
  0xdd   : > { %v1604_v35 = vsel %vm267_vm5, %v1523_v4, %v1571_v2  ;;  %848 = vrot.lane.b32.xlu1 %v3506_v8, %s3418_s21 }
  0xde   : > { %v1620_v36 = vsel %vm268_vm3, %v1604_v35, %v1571_v2  ;;  %2074 = vrot.lane.b32.xlu0 %v3506_v8, %s3420_s23 }
  0xdf   : > { %3137 = vmatprep.mubr.msk.f32.mxu1 %vm403_vm4, %v1620_v36  ;;  %v1525_v37 = vpop.permute.xlu1 %1524 }
  0xe0   : > { %v365_v39 = vpop.permute.xlu0 %364 }
  0xe1   : > { %v398_v7 = vsel %vm268_vm3, %v3653_v33, %v365_v39  ;;  %2076 = vrot.lane.b32.xlu1 %v3523_v11, %s3420_s23 }
  0xe2   : > { %3053 = vmatprep.mubr.msk.f32.mxu0 %vm403_vm4, %v398_v7  ;;  %2028 = vrot.lane.b32.xlu0 %v3516_v10, %s3419_s22 }
  0xe3   : > { %v367_v41 = vpop.permute.xlu1 %366 }
  0xe4   : > { %v1573_v42 = vpop.permute.xlu0 %1572  ;;  %v399_v8 = vsel %vm268_vm3, %v3660_v34, %v367_v41 }
  0xe5   : > { %v1605_v43 = vsel %vm267_vm5, %v1525_v37, %v1573_v42  ;;  %3054 = vmatmul.mubr.msk.f32.gmra.mrb[14].mxu0 %vm403_vm4, %v399_v8  ;;  %2030 = vrot.lane.b32.xlu1 %v3533_v13, %s3419_s22 }
  0xe6   : > { %v1621_v44 = vsel %vm268_vm3, %v1605_v43, %v1573_v42  ;;  %850 = vrot.lane.b32.xlu0 %v3523_v11, %s3418_s21 }
  0xe7   : > { %3138 = vmatmul.mubr.msk.f32.gmra.mrb[14].mxu1 %vm403_vm4, %v1621_v44  ;;  %v1399_v45 = vpop.permute.xlu1 %1398 }
  0xe8   : > { %v1351_v46 = vpop.permute.xlu0 %1350 }
  0xe9   : > { %v1446_v47 = vsel %vm267_vm5, %v1351_v46, %v1399_v45  ;;  %852 = vrot.lane.b32.xlu1 %v3530_v12, %s3418_s21 }
  0xea   : > { %v1462_v48 = vsel %vm268_vm3, %v1446_v47, %v1399_v45  ;;  %2078 = vrot.lane.b32.xlu0 %v3530_v12, %s3420_s23 }
  0xeb   : > { %3144 = vmatprep.mubr.msk.f32.mxu1 %vm403_vm4, %v1462_v48  ;;  %v1353_v49 = vpop.permute.xlu1 %1352 }
  0xec   : > { %v220_v50 = vpop.permute.xlu0 %219 }
  0xed   : > { %v269_v11 = vsel %vm268_vm3, %v3685_v40, %v220_v50  ;;  %2080 = vrot.lane.b32.xlu1 %v3547_v15, %s3420_s23 }
  0xee   : > { %3060 = vmatprep.mubr.msk.f32.mxu0 %vm403_vm4, %v269_v11  ;;  %2032 = vrot.lane.b32.xlu0 %v3540_v14, %s3419_s22 }
  0xef   : > { %v222_v51 = vpop.permute.xlu1 %221 }
  0xf0   : > { %v1401_v53 = vpop.permute.xlu0 %1400  ;;  %v270_v12 = vsel %vm268_vm3, %v3485_v5, %v222_v51 }
  0xf1   : > { %v1447_v54 = vsel %vm267_vm5, %v1353_v49, %v1401_v53  ;;  %2034 = vrot.lane.b32.xlu1 %v3557_v17, %s3419_s22  ;;  %3061 = vmatmul.mubr.msk.f32.vlgmr.msra.gmra.mrb[0].mxu0 %vm403_vm4, %v270_v12 }
  0xf2   : > { %v1463_v55 = vsel %vm268_vm3, %v1447_v54, %v1401_v53  ;;  %854 = vrot.lane.b32.xlu0 %v3547_v15, %s3418_s21  ;;  %3213 = vmatpush3.bf16.msk.msra.mxu0 %vm3463_vm2, %v3852_v52 }
  0xf3   : > { %3145 = vmatmul.mubr.msk.f32.vlgmr.msra.gmra.mrb[0].mxu1 %vm403_vm4, %v1463_v55  ;;  %v1403_v40 = vpop.permute.xlu1 %1402 }
  0xf4   : > { %v1355_v56 = vpop.permute.xlu0 %1354  ;;  %3231 = vmatpush3.bf16.msk.msra.mxu1 %vm3463_vm2, %v3852_v52 }
  0xf5   : > { %v1448_v5 = vsel %vm267_vm5, %v1355_v56, %v1403_v40  ;;  %856 = vrot.lane.b32.xlu1 %v3554_v16, %s3418_s21 }
  0xf6   : > { %v1464_v57 = vsel %vm268_vm3, %v1448_v5, %v1403_v40  ;;  %2082 = vrot.lane.b32.xlu0 %v3554_v16, %s3420_s23 }
  0xf7   : > { %3147 = vmatprep.mubr.msk.f32.mxu1 %vm403_vm4, %v1464_v57  ;;  %v1357_v15 = vpop.permute.xlu1 %1356 }
  0xf8   : > { %v224_v58 = vpop.permute.xlu0 %223 }
  0xf9   : > { %v271_v59 = vsel %vm268_vm3, %v3492_v6, %v224_v58  ;;  %2084 = vrot.lane.b32.xlu1 %v3571_v19, %s3420_s23 }
  0xfa   : > { %3063 = vmatprep.mubr.msk.f32.mxu0 %vm403_vm4, %v271_v59  ;;  %2036 = vrot.lane.b32.xlu0 %v3564_v18, %s3419_s22 }
  0xfb   : > { %v226_v3 = vpop.permute.xlu1 %225 }
  0xfc   : > { %v272_v52 = vsel %vm268_vm3, %v3509_v9, %v226_v3  ;;  %v1405_v16 = vpop.permute.xlu0 %1404 }
  0xfd   : > { %v1449_v60 = vsel %vm267_vm5, %v1357_v15, %v1405_v16  ;;  %2038 = vrot.lane.b32.xlu1 %v3581_v21, %s3419_s22  ;;  %3064 = vmatmul.mubr.msk.f32.gmra.mrb[2].mxu0 %vm403_vm4, %v272_v52  ;;  %v4056_v52 = vld [vmem:[%s3479_s20 + $0x110] sm:$0xff] }
  0xfe   : > { %858 = vrot.lane.b32.xlu0 %v3571_v19, %s3418_s21  ;;  %v1465_v61 = vsel %vm268_vm3, %v1449_v60, %v1405_v16 }
  0xff   : > { %3148 = vmatmul.mubr.msk.f32.gmra.mrb[2].mxu1 %vm403_vm4, %v1465_v61  ;;  %v1407_v62 = vpop.permute.xlu1 %1406 }
 0x100   : > { %v1359_v63 = vpop.permute.xlu0 %1358 }
 0x101   : > { %v1450_v0 = vsel %vm267_vm5, %v1359_v63, %v1407_v62  ;;  %860 = vrot.lane.b32.xlu1 %v3578_v20, %s3418_s21  ;;  %v2846_v63 = vld [vmem:[%s3479_s20 + $0x111] sm:$0xff] }
 0x102   : > { %2086 = vrot.lane.b32.xlu0 %v3578_v20, %s3420_s23  ;;  %v1466_v1 = vsel %vm268_vm3, %v1450_v0, %v1407_v62 }
 0x103   : > { %3150 = vmatprep.mubr.msk.f32.mxu1 %vm403_vm4, %v1466_v1  ;;  %v1361_v2 = vpop.permute.xlu1 %1360 }
 0x104   : > { %v228_v19 = vpop.permute.xlu0 %227 }
 0x105   : > { %v273_v4 = vsel %vm268_vm3, %v3516_v10, %v228_v19  ;;  %2088 = vrot.lane.b32.xlu1 %v3595_v23, %s3420_s23 }
 0x106   : > { %2040 = vrot.lane.b32.xlu0 %v3588_v22, %s3419_s22  ;;  %3066 = vmatprep.mubr.msk.f32.mxu0 %vm403_vm4, %v273_v4 }
 0x107   : > { %v230_v35 = vpop.permute.xlu1 %229 }
 0x108   : > { %v274_v20 = vsel %vm268_vm3, %v3533_v13, %v230_v35  ;;  %v1409_v36 = vpop.permute.xlu0 %1408 }
 0x109   : > { %v1451_v37 = vsel %vm267_vm5, %v1361_v2, %v1409_v36  ;;  %2042 = vrot.lane.b32.xlu1 %v3605_v25, %s3419_s22  ;;  %3067 = vmatmul.mubr.msk.f32.gmra.mrb[4].mxu0 %vm403_vm4, %v274_v20 }
 0x10a   : > { %862 = vrot.lane.b32.xlu0 %v3595_v23, %s3418_s21  ;;  %v1467_v39 = vsel %vm268_vm3, %v1451_v37, %v1409_v36 }
 0x10b   : > { %3151 = vmatmul.mubr.msk.f32.gmra.mrb[4].mxu1 %vm403_vm4, %v1467_v39  ;;  %v1411_v7 = vpop.permute.xlu1 %1410 }
 0x10c   : > { %v1363_v41 = vpop.permute.xlu0 %1362 }
 0x10d   : > { %v1452_v42 = vsel %vm267_vm5, %v1363_v41, %v1411_v7  ;;  %864 = vrot.lane.b32.xlu1 %v3602_v24, %s3418_s21 }
 0x10e   : > { %2090 = vrot.lane.b32.xlu0 %v3602_v24, %s3420_s23  ;;  %v1468_v8 = vsel %vm268_vm3, %v1452_v42, %v1411_v7 }
 0x10f   : > { %3153 = vmatprep.mubr.msk.f32.mxu1 %vm403_vm4, %v1468_v8  ;;  %v1365_v43 = vpop.permute.xlu1 %1364 }
 0x110   : > { %v232_v23 = vpop.permute.xlu0 %231 }
 0x111   : > { %v275_v44 = vsel %vm268_vm3, %v3540_v14, %v232_v23  ;;  %2092 = vrot.lane.b32.xlu1 %v3619_v27, %s3420_s23 }
 0x112   : > { %2044 = vrot.lane.b32.xlu0 %v3612_v26, %s3419_s22  ;;  %3069 = vmatprep.mubr.msk.f32.mxu0 %vm403_vm4, %v275_v44 }
 0x113   : > { %v234_v45 = vpop.permute.xlu1 %233 }
 0x114   : > { %v276_v24 = vsel %vm268_vm3, %v3557_v17, %v234_v45  ;;  %v1413_v46 = vpop.permute.xlu0 %1412 }
 0x115   : > { %v1453_v47 = vsel %vm267_vm5, %v1365_v43, %v1413_v46  ;;  %2046 = vrot.lane.b32.xlu1 %v3629_v29, %s3419_s22  ;;  %3070 = vmatmul.mubr.msk.f32.gmra.mrb[6].mxu0 %vm403_vm4, %v276_v24 }
 0x116   : > { %866 = vrot.lane.b32.xlu0 %v3619_v27, %s3418_s21  ;;  %v1469_v48 = vsel %vm268_vm3, %v1453_v47, %v1413_v46 }
 0x117   : > { %3154 = vmatmul.mubr.msk.f32.gmra.mrb[6].mxu1 %vm403_vm4, %v1469_v48  ;;  %v1415_v49 = vpop.permute.xlu1 %1414 }
 0x118   : > { %v1367_v50 = vpop.permute.xlu0 %1366 }
 0x119   : > { %v1454_v11 = vsel %vm267_vm5, %v1367_v50, %v1415_v49  ;;  %868 = vrot.lane.b32.xlu1 %v3626_v28, %s3418_s21 }
 0x11a   : > { %2094 = vrot.lane.b32.xlu0 %v3626_v28, %s3420_s23  ;;  %v1470_v51 = vsel %vm268_vm3, %v1454_v11, %v1415_v49 }
 0x11b   : > { %3156 = vmatprep.mubr.msk.f32.mxu1 %vm403_vm4, %v1470_v51  ;;  %v1369_v53 = vpop.permute.xlu1 %1368 }
 0x11c   : > { %v236_v27 = vpop.permute.xlu0 %235 }
 0x11d   : > { %v277_v12 = vsel %vm268_vm3, %v3564_v18, %v236_v27  ;;  %2096 = vrot.lane.b32.xlu1 %v3643_v31, %s3420_s23 }
 0x11e   : > { %2048 = vrot.lane.b32.xlu0 %v3636_v30, %s3419_s22  ;;  %3072 = vmatprep.mubr.msk.f32.mxu0 %vm403_vm4, %v277_v12 }
 0x11f   : > { %v238_v54 = vpop.permute.xlu1 %237 }
 0x120   : > { %v278_v28 = vsel %vm268_vm3, %v3581_v21, %v238_v54  ;;  %v1417_v55 = vpop.permute.xlu0 %1416 }
 0x121   : > { %v1455_v40 = vsel %vm267_vm5, %v1369_v53, %v1417_v55  ;;  %2050 = vrot.lane.b32.xlu1 %v3653_v33, %s3419_s22  ;;  %3073 = vmatmul.mubr.msk.f32.gmra.mrb[8].mxu0 %vm403_vm4, %v278_v28 }
 0x122   : > { %870 = vrot.lane.b32.xlu0 %v3643_v31, %s3418_s21  ;;  %v1471_v56 = vsel %vm268_vm3, %v1455_v40, %v1417_v55 }
 0x123   : > { %3157 = vmatmul.mubr.msk.f32.gmra.mrb[8].mxu1 %vm403_vm4, %v1471_v56  ;;  %v1419_v5 = vpop.permute.xlu1 %1418 }
 0x124   : > { %v1371_v57 = vpop.permute.xlu0 %1370 }
 0x125   : > { %v1456_v15 = vsel %vm267_vm5, %v1371_v57, %v1419_v5  ;;  %872 = vrot.lane.b32.xlu1 %v3650_v32, %s3418_s21 }
 0x126   : > { %2098 = vrot.lane.b32.xlu0 %v3650_v32, %s3420_s23  ;;  %v1472_v58 = vsel %vm268_vm3, %v1456_v15, %v1419_v5 }
 0x127   : > { %3159 = vmatprep.mubr.msk.f32.mxu1 %vm403_vm4, %v1472_v58  ;;  %v1373_v31 = vpop.permute.xlu1 %1372 }
 0x128   : > { %v240_v59 = vpop.permute.xlu0 %239 }
 0x129   : > { %v279_v3 = vsel %vm268_vm3, %v3588_v22, %v240_v59  ;;  %2100 = vrot.lane.b32.xlu1 %v3673_v38, %s3420_s23 }
 0x12a   : > { %2052 = vrot.lane.b32.xlu0 %v3660_v34, %s3419_s22  ;;  %3075 = vmatprep.mubr.msk.f32.mxu0 %vm403_vm4, %v279_v3 }
 0x12b   : > { %v242_v32 = vpop.permute.xlu1 %241 }
 0x12c   : > { %v280_v16 = vsel %vm268_vm3, %v3605_v25, %v242_v32  ;;  %v1421_v60 = vpop.permute.xlu0 %1420 }
 0x12d   : > { %v1457_v61 = vsel %vm267_vm5, %v1373_v31, %v1421_v60  ;;  %2054 = vrot.lane.b32.xlu1 %v4056_v52, %s3419_s22  ;;  %3076 = vmatmul.mubr.msk.f32.gmra.mrb[10].mxu0 %vm403_vm4, %v280_v16 }
 0x12e   : > { %v1473_v62 = vsel %vm268_vm3, %v1457_v61, %v1421_v60  ;;  %874 = vrot.lane.b32.xlu0 %v3673_v38, %s3418_s21 }
 0x12f   : > { %3160 = vmatmul.mubr.msk.f32.gmra.mrb[10].mxu1 %vm403_vm4, %v1473_v62  ;;  %v1423_v0 = vpop.permute.xlu1 %1422 }
 0x130   : > { %v1375_v1 = vpop.permute.xlu0 %1374 }
 0x131   : > { %v1458_v2 = vsel %vm267_vm5, %v1375_v1, %v1423_v0  ;;  %876 = vrot.lane.b32.xlu1 %v2846_v63, %s3418_s21 }
 0x132   : > { %2102 = vrot.lane.b32.xlu0 %v2846_v63, %s3420_s23  ;;  %v1474_v19 = vsel %vm268_vm3, %v1458_v2, %v1423_v0 }
 0x133   : > { %3162 = vmatprep.mubr.msk.f32.mxu1 %vm403_vm4, %v1474_v19  ;;  %v1377_v4 = vpop.permute.xlu1 %1376 }
 0x134   : > { %v244_v35 = vpop.permute.xlu0 %243 }
 0x135   : > { %v281_v38 = vsel %vm268_vm3, %v3612_v26, %v244_v35 }
 0x136   : > { %3078 = vmatprep.mubr.msk.f32.mxu0 %vm403_vm4, %v281_v38 }
 0x137   : > { %v246_v20 = vpop.permute.xlu1 %245 }
 0x138   : > { %v282_v36 = vsel %vm268_vm3, %v3629_v29, %v246_v20  ;;  %v1425_v37 = vpop.permute.xlu0 %1424 }
 0x139   : > { %v1459_v39 = vsel %vm267_vm5, %v1377_v4, %v1425_v37  ;;  %3079 = vmatmul.mubr.msk.f32.gmra.mrb[12].mxu0 %vm403_vm4, %v282_v36 }
 0x13a   : > { %v1475_v7 = vsel %vm268_vm3, %v1459_v39, %v1425_v37 }
 0x13b   : > { %3163 = vmatmul.mubr.msk.f32.gmra.mrb[12].mxu1 %vm403_vm4, %v1475_v7  ;;  %v1427_v41 = vpop.permute.xlu1 %1426 }
 0x13c   : > { %v1379_v42 = vpop.permute.xlu0 %1378 }
 0x13d   : > { %v1460_v8 = vsel %vm267_vm5, %v1379_v42, %v1427_v41 }
 0x13e   : > { %v1476_v43 = vsel %vm268_vm3, %v1460_v8, %v1427_v41 }
 0x13f   : > { %3165 = vmatprep.mubr.msk.f32.mxu1 %vm403_vm4, %v1476_v43  ;;  %v1381_v23 = vpop.permute.xlu1 %1380 }
 0x140   : > { %v248_v44 = vpop.permute.xlu0 %247 }
 0x141   : > { %v283_v45 = vsel %vm268_vm3, %v3636_v30, %v248_v44 }
 0x142   : > { %3081 = vmatprep.mubr.msk.f32.mxu0 %vm403_vm4, %v283_v45 }
 0x143   : > { %v250_v24 = vpop.permute.xlu1 %249 }
 0x144   : > { %v284_v46 = vsel %vm268_vm3, %v3653_v33, %v250_v24  ;;  %v1429_v47 = vpop.permute.xlu0 %1428 }
 0x145   : > { %v1461_v48 = vsel %vm267_vm5, %v1381_v23, %v1429_v47  ;;  %3082 = vmatmul.mubr.msk.f32.gmra.mrb[14].mxu0 %vm403_vm4, %v284_v46 }
 0x146   : > { %v1477_v49 = vsel %vm268_vm3, %v1461_v48, %v1429_v47 }
 0x147   : > { %3166 = vmatmul.mubr.msk.f32.gmra.mrb[14].mxu1 %vm403_vm4, %v1477_v49  ;;  %v2073_v50 = vpop.permute.xlu1 %2072 }
 0x148   : > { %v2025_v11 = vpop.permute.xlu0 %2024 }
 0x149   : > { %v2120_v51 = vsel %vm267_vm5, %v2025_v11, %v2073_v50 }
 0x14a   : > { %v2136_v53 = vsel %vm268_vm3, %v2120_v51, %v2073_v50 }
 0x14b   : > { %3172 = vmatprep.mubr.msk.f32.mxu1 %vm403_vm4, %v2136_v53  ;;  %v2027_v27 = vpop.permute.xlu1 %2026 }
 0x14c   : > { %v847_v12 = vpop.permute.xlu0 %846 }
 0x14d   : > { %v894_v54 = vsel %vm268_vm3, %v3492_v6, %v847_v12 }
 0x14e   : > { %3088 = vmatprep.mubr.msk.f32.mxu0 %vm403_vm4, %v894_v54 }
 0x14f   : > { %v849_v28 = vpop.permute.xlu1 %848 }
 0x150   : > { %v895_v55 = vsel %vm268_vm3, %v3509_v9, %v849_v28  ;;  %v2075_v40 = vpop.permute.xlu0 %2074 }
 0x151   : > { %v2121_v56 = vsel %vm267_vm5, %v2027_v27, %v2075_v40  ;;  %3089 = vmatmul.mubr.msk.f32.vlgmr.msra.gmra.mrb[0].mxu0 %vm403_vm4, %v895_v55 }
 0x152   : > { %v2137_v5 = vsel %vm268_vm3, %v2121_v56, %v2075_v40 }
 0x153   : > { %3173 = vmatmul.mubr.msk.f32.vlgmr.msra.gmra.mrb[0].mxu1 %vm403_vm4, %v2137_v5  ;;  %v2077_v57 = vpop.permute.xlu1 %2076 }
 0x154   : > { %v2029_v15 = vpop.permute.xlu0 %2028 }
 0x155   : > { %v2122_v58 = vsel %vm267_vm5, %v2029_v15, %v2077_v57 }
 0x156   : > { %v2138_v6 = vsel %vm268_vm3, %v2122_v58, %v2077_v57 }
 0x157   : > { %3175 = vmatprep.mubr.msk.f32.mxu1 %vm403_vm4, %v2138_v6  ;;  %v2031_v31 = vpop.permute.xlu1 %2030 }
 0x158   : > { %v851_v59 = vpop.permute.xlu0 %850 }
 0x159   : > { %v896_v9 = vsel %vm268_vm3, %v3516_v10, %v851_v59 }
 0x15a   : > { %3091 = vmatprep.mubr.msk.f32.mxu0 %vm403_vm4, %v896_v9 }
 0x15b   : > { %v853_v3 = vpop.permute.xlu1 %852 }
 0x15c   : > { %v897_v32 = vsel %vm268_vm3, %v3533_v13, %v853_v3  ;;  %v2079_v16 = vpop.permute.xlu0 %2078 }
 0x15d   : > { %v2123_v60 = vsel %vm267_vm5, %v2031_v31, %v2079_v16  ;;  %3092 = vmatmul.mubr.msk.f32.gmra.mrb[2].mxu0 %vm403_vm4, %v897_v32 }
 0x15e   : > { %v2139_v61 = vsel %vm268_vm3, %v2123_v60, %v2079_v16 }
 0x15f   : > { %3176 = vmatmul.mubr.msk.f32.gmra.mrb[2].mxu1 %vm403_vm4, %v2139_v61  ;;  %v2081_v62 = vpop.permute.xlu1 %2080 }
 0x160   : > { %v2033_v63 = vpop.permute.xlu0 %2032 }
 0x161   : > { %v2124_v0 = vsel %vm267_vm5, %v2033_v63, %v2081_v62 }
 0x162   : > { %v2140_v10 = vsel %vm268_vm3, %v2124_v0, %v2081_v62 }
 0x163   : > { %3178 = vmatprep.mubr.msk.f32.mxu1 %vm403_vm4, %v2140_v10  ;;  %v2035_v1 = vpop.permute.xlu1 %2034 }
 0x164   : > { %v855_v2 = vpop.permute.xlu0 %854 }
 0x165   : > { %v898_v13 = vsel %vm268_vm3, %v3540_v14, %v855_v2 }
 0x166   : > { %3094 = vmatprep.mubr.msk.f32.mxu0 %vm403_vm4, %v898_v13 }
 0x167   : > { %v857_v19 = vpop.permute.xlu1 %856 }
 0x168   : > { %v899_v4 = vsel %vm268_vm3, %v3557_v17, %v857_v19  ;;  %v2083_v35 = vpop.permute.xlu0 %2082 }
 0x169   : > { %v2125_v38 = vsel %vm267_vm5, %v2035_v1, %v2083_v35  ;;  %3095 = vmatmul.mubr.msk.f32.gmra.mrb[4].mxu0 %vm403_vm4, %v899_v4 }
 0x16a   : > { %v2141_v20 = vsel %vm268_vm3, %v2125_v38, %v2083_v35  ;;  %v3421_v38 = vmov 8  }
 0x16b   : > { %3179 = vmatmul.mubr.msk.f32.gmra.mrb[4].mxu1 %vm403_vm4, %v2141_v20  ;;  %v2085_v36 = vpop.permute.xlu1 %2084  ;;  %3327 = vset.pattern.permute.xlu1 %v3421_v38 }
 0x16c   : > { %v2037_v37 = vpop.permute.xlu0 %2036  ;;  %3328 = vset.pattern.permute.xlu0 %v3421_v38 }
 0x16d   : > { %v2126_v39 = vsel %vm267_vm5, %v2037_v37, %v2085_v36 }
 0x16e   : > { %v2142_v14 = vsel %vm268_vm3, %v2126_v39, %v2085_v36 }
 0x16f   : > { %3181 = vmatprep.mubr.msk.f32.mxu1 %vm403_vm4, %v2142_v14  ;;  %v2039_v7 = vpop.permute.xlu1 %2038 }
 0x170   : > { %v859_v41 = vpop.permute.xlu0 %858 }
 0x171   : > { %v900_v17 = vsel %vm268_vm3, %v3564_v18, %v859_v41 }
 0x172   : > { %3097 = vmatprep.mubr.msk.f32.mxu0 %vm403_vm4, %v900_v17 }
 0x173   : > { %v861_v42 = vpop.permute.xlu1 %860 }
 0x174   : > { %v901_v8 = vsel %vm268_vm3, %v3581_v21, %v861_v42  ;;  %v2087_v43 = vpop.permute.xlu0 %2086 }
 0x175   : > { %v2127_v23 = vsel %vm267_vm5, %v2039_v7, %v2087_v43  ;;  %3098 = vmatmul.mubr.msk.f32.gmra.mrb[6].mxu0 %vm403_vm4, %v901_v8 }
 0x176   : > { %v2143_v44 = vsel %vm268_vm3, %v2127_v23, %v2087_v43 }
 0x177   : > { %3182 = vmatmul.mubr.msk.f32.gmra.mrb[6].mxu1 %vm403_vm4, %v2143_v44  ;;  %v2089_v45 = vpop.permute.xlu1 %2088 }
 0x178   : > { %v2041_v24 = vpop.permute.xlu0 %2040 }
 0x179   : > { %v2128_v46 = vsel %vm267_vm5, %v2041_v24, %v2089_v45 }
 0x17a   : > { %v2144_v18 = vsel %vm268_vm3, %v2128_v46, %v2089_v45 }
 0x17b   : > { %3184 = vmatprep.mubr.msk.f32.mxu1 %vm403_vm4, %v2144_v18  ;;  %v2043_v47 = vpop.permute.xlu1 %2042 }
 0x17c   : > { %v863_v48 = vpop.permute.xlu0 %862 }
 0x17d   : > { %v902_v21 = vsel %vm268_vm3, %v3588_v22, %v863_v48 }
 0x17e   : > { %3100 = vmatprep.mubr.msk.f32.mxu0 %vm403_vm4, %v902_v21 }
 0x17f   : > { %v865_v49 = vpop.permute.xlu1 %864 }
 0x180   : > { %v903_v50 = vsel %vm268_vm3, %v3605_v25, %v865_v49  ;;  %v2091_v11 = vpop.permute.xlu0 %2090 }
 0x181   : > { %v2129_v51 = vsel %vm267_vm5, %v2043_v47, %v2091_v11  ;;  %3101 = vmatmul.mubr.msk.f32.gmra.mrb[8].mxu0 %vm403_vm4, %v903_v50 }
 0x182   : > { %v2145_v53 = vsel %vm268_vm3, %v2129_v51, %v2091_v11 }
 0x183   : > { %3185 = vmatmul.mubr.msk.f32.gmra.mrb[8].mxu1 %vm403_vm4, %v2145_v53  ;;  %v2093_v27 = vpop.permute.xlu1 %2092 }
 0x184   : > { %v2045_v12 = vpop.permute.xlu0 %2044 }
 0x185   : > { %v2130_v54 = vsel %vm267_vm5, %v2045_v12, %v2093_v27 }
 0x186   : > { %v2146_v22 = vsel %vm268_vm3, %v2130_v54, %v2093_v27 }
 0x187   : > { %3187 = vmatprep.mubr.msk.f32.mxu1 %vm403_vm4, %v2146_v22  ;;  %v2047_v28 = vpop.permute.xlu1 %2046 }
 0x188   : > { %v867_v55 = vpop.permute.xlu0 %866 }
 0x189   : > { %v904_v25 = vsel %vm268_vm3, %v3612_v26, %v867_v55 }
 0x18a   : > { %3103 = vmatprep.mubr.msk.f32.mxu0 %vm403_vm4, %v904_v25 }
 0x18b   : > { %v869_v40 = vpop.permute.xlu1 %868 }
 0x18c   : > { %v905_v56 = vsel %vm268_vm3, %v3629_v29, %v869_v40  ;;  %v2095_v5 = vpop.permute.xlu0 %2094 }
 0x18d   : > { %v2131_v57 = vsel %vm267_vm5, %v2047_v28, %v2095_v5  ;;  %3104 = vmatmul.mubr.msk.f32.gmra.mrb[10].mxu0 %vm403_vm4, %v905_v56 }
 0x18e   : > { %v2147_v15 = vsel %vm268_vm3, %v2131_v57, %v2095_v5 }
 0x18f   : > { %3188 = vmatmul.mubr.msk.f32.gmra.mrb[10].mxu1 %vm403_vm4, %v2147_v15  ;;  %v2097_v58 = vpop.permute.xlu1 %2096 }
 0x190   : > { %v2049_v6 = vpop.permute.xlu0 %2048 }
 0x191   : > { %v2132_v31 = vsel %vm267_vm5, %v2049_v6, %v2097_v58 }
 0x192   : > { %v2148_v26 = vsel %vm268_vm3, %v2132_v31, %v2097_v58 }
 0x193   : > { %3190 = vmatprep.mubr.msk.f32.mxu1 %vm403_vm4, %v2148_v26  ;;  %v2051_v59 = vpop.permute.xlu1 %2050 }
 0x194   : > { %v871_v9 = vpop.permute.xlu0 %870 }
 0x195   : > { %v906_v29 = vsel %vm268_vm3, %v3636_v30, %v871_v9 }
 0x196   : > { %3106 = vmatprep.mubr.msk.f32.mxu0 %vm403_vm4, %v906_v29 }
 0x197   : > { %v873_v3 = vpop.permute.xlu1 %872 }
 0x198   : > { %v907_v32 = vsel %vm268_vm3, %v3653_v33, %v873_v3  ;;  %v2099_v16 = vpop.permute.xlu0 %2098 }
 0x199   : > { %v2133_v60 = vsel %vm267_vm5, %v2051_v59, %v2099_v16  ;;  %3107 = vmatmul.mubr.msk.f32.gmra.mrb[12].mxu0 %vm403_vm4, %v907_v32 }
 0x19a   : > { %v2149_v61 = vsel %vm268_vm3, %v2133_v60, %v2099_v16 }
 0x19b   : > { %3191 = vmatmul.mubr.msk.f32.gmra.mrb[12].mxu1 %vm403_vm4, %v2149_v61  ;;  %v2101_v62 = vpop.permute.xlu1 %2100 }
 0x19c   : > { %v2053_v63 = vpop.permute.xlu0 %2052 }
 0x19d   : > { %v2134_v0 = vsel %vm267_vm5, %v2053_v63, %v2101_v62 }
 0x19e   : > { %v2150_v30 = vsel %vm268_vm3, %v2134_v0, %v2101_v62 }
 0x19f   : > { %3193 = vmatprep.mubr.msk.f32.mxu1 %vm403_vm4, %v2150_v30  ;;  %v2055_v10 = vpop.permute.xlu1 %2054 }
 0x1a0   : > { %v875_v1 = vpop.permute.xlu0 %874 }
 0x1a1   : > { %v908_v33 = vsel %vm268_vm3, %v3660_v34, %v875_v1 }
 0x1a2   : > { %3109 = vmatprep.mubr.msk.f32.mxu0 %vm403_vm4, %v908_v33 }
 0x1a3   : > { %v877_v2 = vpop.permute.xlu1 %876 }
 0x1a4   : > { %v909_v13 = vsel %vm268_vm3, %v4056_v52, %v877_v2  ;;  %v2103_v19 = vpop.permute.xlu0 %2102 }
 0x1a5   : > { %v2135_v4 = vsel %vm267_vm5, %v2055_v10, %v2103_v19  ;;  %3110 = vmatmul.mubr.msk.f32.gmra.mrb[14].mxu0 %vm403_vm4, %v909_v13 }
 0x1a6   : > { %v2151_v35 = vsel %vm268_vm3, %v2135_v4, %v2103_v19 }
 0x1a7   : > { %3194 = vmatmul.mubr.msk.f32.gmra.mrb[14].mxu1 %vm403_vm4, %v2151_v35 }
 0x224   : > { %v4191_v20 = vpop.f32.mrb[0].mxu0 }
 0x225   : > { %v1158_v34 = vadd.f32 1e-08, %v4191_v20  ;;  %v4194_v36 = vpop.f32.mrb[1].mxu0  ;;  %v1126_v41 = vmax.f32 %v4191_v20, 0.0 }
 0x226   : > { %v1157_v52 = vadd.f32 1e-08, %v4194_v36  ;;  %v4197_v37 = vpop.f32.mrb[0].mxu1  ;;  %v1125_v17 = vmax.f32 %v4194_v36, 0.0 }
 0x227   : > { %3329 = vrcp.f32 %v1158_v34  ;;  %v2394_v39 = vadd.f32 1e-08, %v4197_v37  ;;  %v4200_v14 = vpop.f32.mrb[1].mxu1  ;;  %v4210_v45 = vmin.f32 %v1126_v41, 1.0  ;;  %v2362_v50 = vmax.f32 %v4197_v37, 0.0 }
 0x228   : > { %3331 = vrcp.f32 %v1157_v52  ;;  %v2393_v7 = vadd.f32 1e-08, %v4200_v14  ;;  %v2361_v46 = vmax.f32 %v4200_v14, 0.0  ;;  %v4216_v21 = vmin.f32 %v1125_v17, 1.0 }
 0x229   : > { %3333 = vrcp.f32 %v2394_v39  ;;  %v4227_v25 = vmin.f32 %v2362_v50, 1.0 }
 0x22a   : > { %3335 = vrcp.f32 %v2393_v7  ;;  %v4224_v28 = vmin.f32 %v2361_v46, 1.0 }
 0x230   : > { %v4205_v42 = vpop.f32.mrb[2].mxu0 }
 0x231   : > { %v3330_v8 = vpop.eup %3329  ;;  %v1160_v43 = vadd.f32 1e-08, %v4205_v42  ;;  %v4208_v23 = vpop.f32.mrb[3].mxu0  ;;  %v1128_v5 = vmax.f32 %v4205_v42, 0.0 }
 0x232   : > { %v3332_v44 = vpop.eup %3331  ;;  %v1190_v24 = vmul.f32 9.0, %v3330_v8  ;;  %v1159_v18 = vadd.f32 1e-08, %v4208_v23  ;;  %v4214_v47 = vpop.f32.mrb[2].mxu1  ;;  %v1127_v57 = vmax.f32 %v4208_v23, 0.0 }
 0x233   : > { %v3334_v48 = vpop.eup %3333  ;;  %v1189_v49 = vmul.f32 9.0, %v3332_v44  ;;  %3337 = vrcp.f32 %v1160_v43  ;;  %v4219_v11 = vpop.f32.mrb[3].mxu1  ;;  %v2396_v22 = vadd.f32 1e-08, %v4214_v47  ;;  %v4238_v59 = vmin.f32 %v1128_v5, 1.0 }
 0x234   : > { %v3336_v51 = vpop.eup %3335  ;;  %v1206_v53 = vmul.f32 %v1190_v24, %v4210_v45  ;;  %3339 = vrcp.f32 %v1159_v18  ;;  %v2426_v12 = vmul.f32 9.0, %v3334_v48  ;;  %v2395_v55 = vadd.f32 1e-08, %v4219_v11 }
 0x235   : > { %v1205_v27 = vmul.f32 %v1189_v49, %v4216_v21  ;;  %v2425_v54 = vmul.f32 9.0, %v3336_v51  ;;  %3341 = vrcp.f32 %v2396_v22  ;;  %v2364_v29 = vmax.f32 %v4214_v47, 0.0 }
 0x236   : > { %1228 = vperm.xlu1 %3327, %v1206_v53   ;;  %3343 = vrcp.f32 %v2395_v55  ;;  %v2442_v56 = vmul.f32 %v2426_v12, %v4227_v25  ;;  %v4244_v16 = vmin.f32 %v1127_v57, 1.0  ;;  %v2363_v61 = vmax.f32 %v4219_v11, 0.0 }
 0x237   : > { %1223 = vperm.xlu0 %3328, %v1205_v27   ;;  %v2441_v40 = vmul.f32 %v2425_v54, %v4224_v28  ;;  %v4253_v2 = vmin.f32 %v2364_v29, 1.0 }
 0x238   : > { %v4255_v19 = vmin.f32 %v2363_v61, 1.0 }
 0x23a   : > { %2459 = vperm.xlu1 %3327, %v2441_v40  }
 0x23b   : > { %2464 = vperm.xlu0 %3328, %v2442_v56  }
 0x23c   : > { %v4233_v15 = vpop.f32.mrb[4].mxu0 }
 0x23d   : > { %v3338_v58 = vpop.eup %3337  ;;  %v1162_v6 = vadd.f32 1e-08, %v4233_v15  ;;  %v4236_v31 = vpop.f32.mrb[5].mxu0  ;;  %v1130_v34 = vmax.f32 %v4233_v15, 0.0 }
 0x23e   : > { %v3340_v26 = vpop.eup %3339  ;;  %v1192_v9 = vmul.f32 9.0, %v3338_v58  ;;  %v1161_v3 = vadd.f32 1e-08, %v4236_v31  ;;  %v4242_v32 = vpop.f32.mrb[4].mxu1  ;;  %v1129_v52 = vmax.f32 %v4236_v31, 0.0 }
 0x23f   : > { %v1191_v60 = vmul.f32 9.0, %v3340_v26  ;;  %3345 = vrcp.f32 %v1162_v6  ;;  %v4247_v62 = vpop.f32.mrb[5].mxu1  ;;  %v2398_v0 = vadd.f32 1e-08, %v4242_v32  ;;  %v3342_v30 = vpop.eup %3341  ;;  %v4266_v43 = vmin.f32 %v1130_v34, 1.0 }
 0x240   : > { %v1208_v63 = vmul.f32 %v1192_v9, %v4238_v59  ;;  %3347 = vrcp.f32 %v1161_v3  ;;  %v2397_v1 = vadd.f32 1e-08, %v4247_v62  ;;  %v3344_v33 = vpop.eup %3343  ;;  %v2428_v13 = vmul.f32 9.0, %v3342_v30 }
 0x241   : > { %v1207_v10 = vmul.f32 %v1191_v60, %v4244_v16  ;;  %3349 = vrcp.f32 %v2398_v0  ;;  %v2427_v4 = vmul.f32 9.0, %v3344_v33  ;;  %v2366_v24 = vmax.f32 %v4242_v32, 0.0 }
 0x242   : > { %1238 = vperm.xlu0 %3328, %v1208_v63   ;;  %3351 = vrcp.f32 %v2397_v1  ;;  %v2444_v35 = vmul.f32 %v2428_v13, %v4253_v2  ;;  %v4272_v48 = vmin.f32 %v1129_v52, 1.0  ;;  %v2365_v50 = vmax.f32 %v4247_v62, 0.0 }
 0x243   : > { %1233 = vperm.xlu1 %3327, %v1207_v10   ;;  %v2443_v38 = vmul.f32 %v2427_v4, %v4255_v19  ;;  %v4280_v40 = vmin.f32 %v2366_v24, 1.0 }
 0x244   : > { %v4283_v57 = vmin.f32 %v2365_v50, 1.0 }
 0x246   : > { %2474 = vperm.xlu0 %3328, %v2444_v35  }
 0x247   : > { %2469 = vperm.xlu1 %3327, %v2443_v38  }
 0x248   : > { %v4261_v39 = vpop.f32.mrb[6].mxu0 }
 0x249   : > { %v3346_v7 = vpop.eup %3345  ;;  %v1164_v41 = vadd.f32 1e-08, %v4261_v39  ;;  %v4264_v17 = vpop.f32.mrb[7].mxu0  ;;  %v1132_v26 = vmax.f32 %v4261_v39, 0.0 }
 0x24a   : > { %v3348_v8 = vpop.eup %3347  ;;  %v1194_v44 = vmul.f32 9.0, %v3346_v7  ;;  %v1163_v46 = vadd.f32 1e-08, %v4264_v17  ;;  %v4270_v18 = vpop.f32.mrb[6].mxu1  ;;  %v1131_v9 = vmax.f32 %v4264_v17, 0.0 }
 0x24b   : > { %v1193_v49 = vmul.f32 9.0, %v3348_v8  ;;  %3353 = vrcp.f32 %v1164_v41  ;;  %v4275_v51 = vpop.f32.mrb[7].mxu1  ;;  %v3350_v53 = vpop.eup %3349  ;;  %v2400_v12 = vadd.f32 1e-08, %v4270_v18  ;;  %v4294_v0 = vmin.f32 %v1132_v26, 1.0 }
 0x24c   : > { %v1210_v27 = vmul.f32 %v1194_v44, %v4266_v43  ;;  %3355 = vrcp.f32 %v1163_v46  ;;  %v3352_v54 = vpop.eup %3351  ;;  %v2430_v55 = vmul.f32 9.0, %v3350_v53  ;;  %v2399_v5 = vadd.f32 1e-08, %v4275_v51 }
 0x24d   : > { %v1209_v22 = vmul.f32 %v1193_v49, %v4272_v48  ;;  %v2429_v56 = vmul.f32 9.0, %v3352_v54  ;;  %3357 = vrcp.f32 %v2400_v12  ;;  %v2368_v10 = vmax.f32 %v4270_v18, 0.0 }
 0x24e   : > { %1248 = vperm.xlu0 %3328, %v1210_v27   ;;  %v2446_v58 = vmul.f32 %v2430_v55, %v4280_v40  ;;  %3359 = vrcp.f32 %v2399_v5  ;;  %v4300_v13 = vmin.f32 %v1131_v9, 1.0  ;;  %v2367_v35 = vmax.f32 %v4275_v51, 0.0 }
 0x24f   : > { %1243 = vperm.xlu1 %3327, %v1209_v22   ;;  %v2445_v6 = vmul.f32 %v2429_v56, %v4283_v57  ;;  %v4308_v24 = vmin.f32 %v2368_v10, 1.0 }
 0x250   : > { %v4311_v49 = vmin.f32 %v2367_v35, 1.0 }
 0x252   : > { %2484 = vperm.xlu0 %3328, %v2446_v58  }
 0x253   : > { %2479 = vperm.xlu1 %3327, %v2445_v6  }
 0x254   : > { %v4289_v29 = vpop.f32.mrb[8].mxu0 }
 0x255   : > { %v3354_v3 = vpop.eup %3353  ;;  %v1166_v60 = vadd.f32 1e-08, %v4289_v29  ;;  %v4292_v61 = vpop.f32.mrb[9].mxu0  ;;  %v1134_v12 = vmax.f32 %v4289_v29, 0.0 }
 0x256   : > { %v3356_v63 = vpop.eup %3355  ;;  %v1196_v30 = vmul.f32 9.0, %v3354_v3  ;;  %v1165_v1 = vadd.f32 1e-08, %v4292_v61  ;;  %v4298_v33 = vpop.f32.mrb[8].mxu1  ;;  %v1133_v54 = vmax.f32 %v4292_v61, 0.0 }
 0x257   : > { %v1195_v4 = vmul.f32 9.0, %v3356_v63  ;;  %3361 = vrcp.f32 %v1166_v60  ;;  %v4303_v38 = vpop.f32.mrb[9].mxu1  ;;  %v3358_v34 = vpop.eup %3357  ;;  %v2402_v7 = vadd.f32 1e-08, %v4298_v33  ;;  %v4322_v6 = vmin.f32 %v1134_v12, 1.0 }
 0x258   : > { %v1212_v52 = vmul.f32 %v1196_v30, %v4294_v0  ;;  %3363 = vrcp.f32 %v1165_v1  ;;  %v2432_v8 = vmul.f32 9.0, %v3358_v34  ;;  %v3360_v44 = vpop.eup %3359  ;;  %v2401_v46 = vadd.f32 1e-08, %v4303_v38 }
 0x259   : > { %v1211_v41 = vmul.f32 %v1195_v4, %v4300_v13  ;;  %3365 = vrcp.f32 %v2402_v7  ;;  %v2431_v50 = vmul.f32 9.0, %v3360_v44  ;;  %v2370_v9 = vmax.f32 %v4298_v33, 0.0 }
 0x25a   : > { %1258 = vperm.xlu0 %3328, %v1212_v52   ;;  %v2448_v53 = vmul.f32 %v2432_v8, %v4308_v24  ;;  %3367 = vrcp.f32 %v2401_v46  ;;  %v4328_v63 = vmin.f32 %v1133_v54, 1.0  ;;  %v2369_v10 = vmax.f32 %v4303_v38, 0.0 }
 0x25b   : > { %1253 = vperm.xlu1 %3327, %v1211_v41   ;;  %v2447_v27 = vmul.f32 %v2431_v50, %v4311_v49  ;;  %v4336_v8 = vmin.f32 %v2370_v9, 1.0 }
 0x25c   : > { %v4339_v46 = vmin.f32 %v2369_v10, 1.0 }
 0x25e   : > { %2494 = vperm.xlu0 %3328, %v2448_v53  }
 0x25f   : > { %2489 = vperm.xlu1 %3327, %v2447_v27  }
 0x260   : > { %v4317_v22 = vpop.f32.mrb[10].mxu0 }
 0x261   : > { %v3362_v55 = vpop.eup %3361  ;;  %v1168_v56 = vadd.f32 1e-08, %v4317_v22  ;;  %v4320_v5 = vpop.f32.mrb[11].mxu0  ;;  %v1136_v12 = vmax.f32 %v4317_v22, 0.0 }
 0x262   : > { %v3364_v58 = vpop.eup %3363  ;;  %v1198_v26 = vmul.f32 9.0, %v3362_v55  ;;  %v1167_v3 = vadd.f32 1e-08, %v4320_v5  ;;  %v4326_v60 = vpop.f32.mrb[10].mxu1  ;;  %v1135_v54 = vmax.f32 %v4320_v5, 0.0 }
 0x263   : > { %4551 = vst [vmem:[#allocation2_spill] sm:$0xff] %v4326_v60  ;;  %v1197_v30 = vmul.f32 9.0, %v3364_v58  ;;  %3369 = vrcp.f32 %v1168_v56  ;;  %v4331_v1 = vpop.f32.mrb[11].mxu1  ;;  %v3366_v4 = vpop.eup %3365  ;;  %v2404_v34 = vadd.f32 1e-08, %v4326_v60  ;;  %v2372_v10 = vmax.f32 %v4326_v60, 0.0 }
 0x264   : > { %4552 = vst [vmem:[#allocation3_spill] sm:$0xff] %v4331_v1  ;;  %v1214_v35 = vmul.f32 %v1198_v26, %v4322_v6  ;;  %3371 = vrcp.f32 %v1167_v3  ;;  %v2434_v7 = vmul.f32 9.0, %v3366_v4  ;;  %v3368_v41 = vpop.eup %3367  ;;  %v2403_v44 = vadd.f32 1e-08, %v4331_v1 }
 0x265   : > { %v1213_v52 = vmul.f32 %v1197_v30, %v4328_v63  ;;  %3373 = vrcp.f32 %v2404_v34  ;;  %v2433_v50 = vmul.f32 9.0, %v3368_v41  ;;  %v4350_v3 = vmin.f32 %v1136_v12, 1.0 }
 0x266   : > { %1268 = vperm.xlu0 %3328, %v1214_v35   ;;  %v2450_v53 = vmul.f32 %v2434_v7, %v4336_v8  ;;  %3375 = vrcp.f32 %v2403_v44  ;;  %v4356_v34 = vmin.f32 %v1135_v54, 1.0  ;;  %v2371_v7 = vmax.f32 %v4331_v1, 0.0 }
 0x267   : > { %1263 = vperm.xlu1 %3327, %v1213_v52   ;;  %v2449_v27 = vmul.f32 %v2433_v50, %v4339_v46  ;;  %4555 = vst [vmem:[#allocation6_spill] sm:$0xff] %v4350_v3  ;;  %v4364_v60 = vmin.f32 %v2372_v10, 1.0 }
 0x268   : > { %4557 = vst [vmem:[#allocation8_spill] sm:$0xff] %v4356_v34 }
 0x269   : > { %4559 = vst [vmem:[#allocation10_spill] sm:$0xff] %v4364_v60 }
 0x26a   : > { %2504 = vperm.xlu0 %3328, %v2450_v53  }
 0x26b   : > { %2499 = vperm.xlu1 %3327, %v2449_v27  }
 0x26c   : > { %v4345_v55 = vpop.f32.mrb[12].mxu0 }
 0x26d   : > { %4553 = vst [vmem:[#allocation4_spill] sm:$0xff] %v4345_v55  ;;  %v3370_v56 = vpop.eup %3369  ;;  %v1170_v58 = vadd.f32 1e-08, %v4345_v55  ;;  %v4348_v26 = vpop.f32.mrb[13].mxu0 }
 0x26e   : > { %4554 = vst [vmem:[#allocation5_spill] sm:$0xff] %v4348_v26  ;;  %v3372_v9 = vpop.eup %3371  ;;  %v1200_v30 = vmul.f32 9.0, %v3370_v56  ;;  %v1169_v4 = vadd.f32 1e-08, %v4348_v26  ;;  %v4354_v35 = vpop.f32.mrb[12].mxu1 }
 0x26f   : > { %4556 = vst [vmem:[#allocation7_spill] sm:$0xff] %v4354_v35  ;;  %v1199_v52 = vmul.f32 9.0, %v3372_v9  ;;  %3377 = vrcp.f32 %v1170_v58  ;;  %v4359_v41 = vpop.f32.mrb[13].mxu1  ;;  %v3374_v44 = vpop.eup %3373  ;;  %v2406_v53 = vadd.f32 1e-08, %v4354_v35  ;;  %v4367_v9 = vmin.f32 %v2371_v7, 1.0 }
 0x270   : > { %4558 = vst [vmem:[#allocation9_spill] sm:$0xff] %v4359_v41  ;;  %v1216_v50 = vmul.f32 %v1200_v30, %v4350_v3  ;;  %3379 = vrcp.f32 %v1169_v4  ;;  %v2436_v12 = vmul.f32 9.0, %v3374_v44  ;;  %v3376_v56 = vpop.eup %3375  ;;  %v2405_v54 = vadd.f32 1e-08, %v4359_v41 }
 0x271   : > { %v1215_v27 = vmul.f32 %v1199_v52, %v4356_v34  ;;  %3381 = vrcp.f32 %v2406_v53  ;;  %4560 = vst [vmem:[#allocation11_spill] sm:$0xff] %v4367_v9  ;;  %v2435_v58 = vmul.f32 9.0, %v3376_v56  ;;  %v1138_v4 = vmax.f32 %v4345_v55, 0.0 }
 0x272   : > { %1278 = vperm.xlu0 %3328, %v1216_v50   ;;  %v2452_v1 = vmul.f32 %v2436_v12, %v4364_v60  ;;  %3383 = vrcp.f32 %v2405_v54  ;;  %v1137_v52 = vmax.f32 %v4348_v26, 0.0  ;;  %v2374_v56 = vmax.f32 %v4354_v35, 0.0 }
 0x273   : > { %1273 = vperm.xlu1 %3327, %v1215_v27   ;;  %v2451_v30 = vmul.f32 %v2435_v58, %v4367_v9  ;;  %v4378_v27 = vmin.f32 %v1138_v4, 1.0  ;;  %v2373_v26 = vmax.f32 %v4359_v41, 0.0 }
 0x274   : > { %v4392_v3 = vmin.f32 %v2374_v56, 1.0 }
 0x276   : > { %2514 = vperm.xlu0 %3328, %v2452_v1   ;;  %v4384_v1 = vmin.f32 %v1137_v52, 1.0 }
 0x277   : > { %2509 = vperm.xlu1 %3327, %v2451_v30  }
 0x278   : > { %v4373_v10 = vpop.f32.mrb[14].mxu0 }
 0x279   : > { %4561 = vst [vmem:[#allocation12_spill] sm:$0xff] %v4373_v10  ;;  %v3378_v44 = vpop.eup %3377  ;;  %v1172_v50 = vadd.f32 1e-08, %v4373_v10  ;;  %v4376_v7 = vpop.f32.mrb[15].mxu0 }
 0x27a   : > { %4562 = vst [vmem:[#allocation13_spill] sm:$0xff] %v4376_v7  ;;  %v3380_v53 = vpop.eup %3379  ;;  %v1202_v12 = vmul.f32 9.0, %v3378_v44  ;;  %v1171_v54 = vadd.f32 1e-08, %v4376_v7  ;;  %v4382_v58 = vpop.f32.mrb[14].mxu1 }
 0x27b   : > { %4563 = vst [vmem:[#allocation14_spill] sm:$0xff] %v4382_v58  ;;  %v1201_v30 = vmul.f32 9.0, %v3380_v53  ;;  %3385 = vrcp.f32 %v1172_v50  ;;  %v4387_v55 = vpop.f32.mrb[15].mxu1  ;;  %v3382_v9 = vpop.eup %3381  ;;  %v2408_v4 = vadd.f32 1e-08, %v4382_v58  ;;  %v4395_v53 = vmin.f32 %v2373_v26, 1.0 }
 0x27c   : > { %4564 = vst [vmem:[#allocation15_spill] sm:$0xff] %v4387_v55  ;;  %v1218_v34 = vmul.f32 %v1202_v12, %v4378_v27  ;;  %3387 = vrcp.f32 %v1171_v54  ;;  %v2438_v35 = vmul.f32 9.0, %v3382_v9  ;;  %v3384_v60 = vpop.eup %3383  ;;  %v2407_v52 = vadd.f32 1e-08, %v4387_v55 }
 0x27d   : > { %v1217_v44 = vmul.f32 %v1201_v30, %v4384_v1  ;;  %3389 = vrcp.f32 %v2408_v4  ;;  %v2437_v50 = vmul.f32 9.0, %v3384_v60  ;;  %v1140_v54 = vmax.f32 %v4373_v10, 0.0 }
 0x27e   : > { %1288 = vperm.xlu0 %3328, %v1218_v34   ;;  %v2454_v41 = vmul.f32 %v2438_v35, %v4392_v3  ;;  %3391 = vrcp.f32 %v2407_v52  ;;  %v1139_v9 = vmax.f32 %v4376_v7, 0.0  ;;  %v2376_v26 = vmax.f32 %v4382_v58, 0.0 }
 0x27f   : > { %1283 = vperm.xlu1 %3327, %v1217_v44   ;;  %v2453_v12 = vmul.f32 %v2437_v50, %v4395_v53  ;;  %v4401_v4 = vmin.f32 %v1140_v54, 1.0  ;;  %v2375_v35 = vmax.f32 %v4387_v55, 0.0 }
 0x280   : > { %v4404_v60 = vmin.f32 %v1139_v9, 1.0 }
 0x281   : > { %v4411_v54 = vmin.f32 %v2375_v35, 1.0 }
 0x282   : > { %2524 = vperm.xlu0 %3328, %v2454_v41  }
 0x283   : > { %2519 = vperm.xlu1 %3327, %v2453_v12   ;;  %v4409_v12 = vmin.f32 %v2376_v26, 1.0 }
 0x285   : > { %v3386_v56 = vpop.eup %3385 }
 0x286   : > { %v3388_v30 = vpop.eup %3387  ;;  %v1204_v34 = vmul.f32 9.0, %v3386_v56 }
 0x287   : > { %v1203_v44 = vmul.f32 9.0, %v3388_v30  ;;  %v3390_v52 = vpop.eup %3389 }
 0x288   : > { %v1220_v50 = vmul.f32 %v1204_v34, %v4401_v4  ;;  %v2440_v10 = vmul.f32 9.0, %v3390_v52  ;;  %v3392_v7 = vpop.eup %3391 }
 0x289   : > { %v1219_v41 = vmul.f32 %v1203_v44, %v4404_v60  ;;  %v2439_v56 = vmul.f32 9.0, %v3392_v7 }
 0x28a   : > { %1298 = vperm.xlu0 %3328, %v1220_v50   ;;  %v2456_v9 = vmul.f32 %v2440_v10, %v4409_v12 }
 0x28b   : > { %1293 = vperm.xlu1 %3327, %v1219_v41   ;;  %v2455_v30 = vmul.f32 %v2439_v56, %v4411_v54 }
 0x28e   : > { %2534 = vperm.xlu0 %3328, %v2456_v9  }
 0x28f   : > { %2529 = vperm.xlu1 %3327, %v2455_v30  }
 0x2b5   : > { %v1229_v55 = vpop.permute.xlu1 %1228 }
 0x2b6   : > { %v1224_v58 = vpop.permute.xlu0 %1223  ;;  %v1302_v44 = vmul.f32 %v4191_v20, %v1229_v55 }
 0x2b7   : > { %v1301_v34 = vmul.f32 %v1224_v58, %v4194_v36 }
 0x2b8   : > { %v1319_v41 = vsel %vm1317_vm6, %v1302_v44, %v4210_v45 }
 0x2b9   : > { %v2460_v26 = vpop.permute.xlu1 %2459  ;;  %v1318_v10 = vsel %vm1317_vm6, %v1301_v34, %v4216_v21 }
 0x2ba   : > { %v2537_v52 = vmul.f32 %v2460_v26, %v4200_v14  ;;  %v2465_v35 = vpop.permute.xlu0 %2464 }
 0x2bb   : > { %v2538_v7 = vmul.f32 %v4197_v37, %v2465_v35 }
 0x2bc   : > { %v2553_v50 = vsel %vm1317_vm6, %v2537_v52, %v4224_v28 }
 0x2bd   : > { %v2569_v56 = vmax.f32 %v1318_v10, %v2553_v50  ;;  %v2554_v36 = vsel %vm1317_vm6, %v2538_v7, %v4227_v25 }
 0x2be   : > { %v2570_v20 = vmax.f32 %v1319_v41, %v2554_v36 }
 0x2c0   : > { %v2585_v55 = vmax.f32 %v2569_v56, %v2570_v20 }
 0x2c1   : > { %v1239_v58 = vpop.permute.xlu0 %1238 }
 0x2c2   : > { %v1234_v14 = vpop.permute.xlu1 %1233  ;;  %vm2593_vm7 = vcmp.ge.f32.partialorder %v2585_v55, 0.0  ;;  %v2601_v9 = vmul.f32 0.1, %v2585_v55  ;;  %v1304_v37 = vmul.f32 %v4205_v42, %v1239_v58 }
 0x2c3   : > { %v1303_v30 = vmul.f32 %v1234_v14, %v4208_v23 }
 0x2c4   : > { %v2609_v21 = vsel %vm2593_vm7, %v2585_v55, %v2601_v9  ;;  %v1321_v26 = vsel %vm1317_vm6, %v1304_v37, %v4238_v59 }
 0x2c5   : > { %v2475_v28 = vpop.permute.xlu0 %2474  ;;  %v2618_v34 = vsel %vm2617_vm8, %v2609_v21, 0.0  ;;  %v1320_v42 = vsel %vm1317_vm6, %v1303_v30, %v4244_v16 }
 0x2c6   : > { %v2540_v45 = vmul.f32 %v4214_v47, %v2475_v28  ;;  %v2470_v44 = vpop.permute.xlu1 %2469  ;;  %2626 = vxpose.xlu1.b32.start [1/8] (short) (narrow) %v2618_v34, 16 }
 0x2c7   : > { %v2539_v25 = vmul.f32 %v2470_v44, %v4219_v11 }
 0x2c8   : > { %v2556_v52 = vsel %vm1317_vm6, %v2540_v45, %v4253_v2 }
 0x2c9   : > { %v2572_v35 = vmax.f32 %v1321_v26, %v2556_v52  ;;  %v2555_v23 = vsel %vm1317_vm6, %v2539_v25, %v4255_v19 }
 0x2ca   : > { %v2571_v7 = vmax.f32 %v1320_v42, %v2555_v23 }
 0x2cc   : > { %v2586_v10 = vmax.f32 %v2571_v7, %v2572_v35 }
 0x2cd   : > { %v1249_v47 = vpop.permute.xlu0 %1248 }
 0x2ce   : > { %v1244_v50 = vpop.permute.xlu1 %1243  ;;  %vm2594_vm9 = vcmp.ge.f32.partialorder %v2586_v10, 0.0  ;;  %v2602_v41 = vmul.f32 0.1, %v2586_v10  ;;  %v1306_v11 = vmul.f32 %v4233_v15, %v1249_v47 }
 0x2cf   : > { %v1305_v59 = vmul.f32 %v1244_v50, %v4236_v31 }
 0x2d0   : > { %v2610_v56 = vsel %vm2594_vm9, %v2586_v10, %v2602_v41  ;;  %v1323_v55 = vsel %vm1317_vm6, %v1306_v11, %v4266_v43 }
 0x2d1   : > { %v2485_v36 = vpop.permute.xlu0 %2484  ;;  %v2619_v2 = vsel %vm2617_vm8, %v2610_v56, 0.0  ;;  %v1322_v15 = vsel %vm1317_vm6, %v1305_v59, %v4272_v48 }
 0x2d2   : > { %v2542_v16 = vmul.f32 %v4242_v32, %v2485_v36  ;;  %v2480_v20 = vpop.permute.xlu1 %2479  ;;  %2627 = vxpose.xlu1.b32.cont [2/8] (short) (narrow) %v2619_v2, 16 }
 0x2d3   : > { %v2541_v19 = vmul.f32 %v2480_v20, %v4247_v62 }
 0x2d4   : > { %v2558_v58 = vsel %vm1317_vm6, %v2542_v16, %v4280_v40 }
 0x2d5   : > { %v2574_v14 = vmax.f32 %v1323_v55, %v2558_v58  ;;  %v2557_v31 = vsel %vm1317_vm6, %v2541_v19, %v4283_v57  ;;  %v4565_v19 = vld [vmem:[#allocation2_spill] sm:$0xff]  ;;  %v4566_v58 = vld [vmem:[#allocation3_spill] sm:$0xff] }
 0x2d6   : > { %v2573_v9 = vmax.f32 %v1322_v15, %v2557_v31  ;;  %v4567_v15 = vld [vmem:[#allocation6_spill] sm:$0xff] }
 0x2d7   : > { %v4568_v31 = vld [vmem:[#allocation10_spill] sm:$0xff] }
 0x2d8   : > { %v2587_v37 = vmax.f32 %v2573_v9, %v2574_v14 }
 0x2d9   : > { %v1259_v32 = vpop.permute.xlu0 %1258 }
 0x2da   : > { %v1254_v21 = vpop.permute.xlu1 %1253  ;;  %vm2595_vm10 = vcmp.ge.f32.partialorder %v2587_v37, 0.0  ;;  %v2603_v30 = vmul.f32 0.1, %v2587_v37  ;;  %v1308_v62 = vmul.f32 %v4261_v39, %v1259_v32 }
 0x2db   : > { %v1307_v43 = vmul.f32 %v1254_v21, %v4264_v17 }
 0x2dc   : > { %v2611_v28 = vsel %vm2595_vm10, %v2587_v37, %v2603_v30  ;;  %v1325_v44 = vsel %vm1317_vm6, %v1308_v62, %v4294_v0  ;;  %v4569_v37 = vld [vmem:[#allocation8_spill] sm:$0xff] }
 0x2dd   : > { %v2495_v34 = vpop.permute.xlu0 %2494  ;;  %v2620_v40 = vsel %vm2617_vm8, %v2611_v28, 0.0  ;;  %v1324_v39 = vsel %vm1317_vm6, %v1307_v43, %v4300_v13 }
 0x2de   : > { %v2544_v48 = vmul.f32 %v4270_v18, %v2495_v34  ;;  %v2490_v45 = vpop.permute.xlu1 %2489  ;;  %2628 = vxpose.xlu1.b32.cont [3/8] (short) (narrow) %v2620_v40, 16  ;;  %v4571_v40 = vld [vmem:[#allocation4_spill] sm:$0xff] }
 0x2df   : > { %v2543_v57 = vmul.f32 %v2490_v45, %v4275_v51 }
 0x2e0   : > { %v2560_v25 = vsel %vm1317_vm6, %v2544_v48, %v4308_v24 }
 0x2e1   : > { %v2576_v26 = vmax.f32 %v1325_v44, %v2560_v25  ;;  %v2559_v17 = vsel %vm1317_vm6, %v2543_v57, %v4311_v49  ;;  %v4572_v57 = vld [vmem:[#allocation5_spill] sm:$0xff] }
 0x2e2   : > { %v2575_v52 = vmax.f32 %v1324_v39, %v2559_v17 }
 0x2e4   : > { %v2588_v42 = vmax.f32 %v2575_v52, %v2576_v26  ;;  %v4573_v26 = vld [vmem:[#allocation7_spill] sm:$0xff] }
 0x2e5   : > { %v1269_v18 = vpop.permute.xlu0 %1268 }
 0x2e6   : > { %v1264_v35 = vpop.permute.xlu1 %1263  ;;  %vm2596_vm11 = vcmp.ge.f32.partialorder %v2588_v42, 0.0  ;;  %v2604_v23 = vmul.f32 0.1, %v2588_v42  ;;  %v1310_v51 = vmul.f32 %v4289_v29, %v1269_v18 }
 0x2e7   : > { %v1309_v0 = vmul.f32 %v1264_v35, %v4292_v61 }
 0x2e8   : > { %v2612_v7 = vsel %vm2596_vm11, %v2588_v42, %v2604_v23  ;;  %v1327_v50 = vsel %vm1317_vm6, %v1310_v51, %v4322_v6  ;;  %v4574_v42 = vld [vmem:[#allocation9_spill] sm:$0xff] }
 0x2e9   : > { %v2505_v10 = vpop.permute.xlu0 %2504  ;;  %v2621_v24 = vsel %vm2617_vm8, %v2612_v7, 0.0  ;;  %v1326_v29 = vsel %vm1317_vm6, %v1309_v0, %v4328_v63 }
 0x2ea   : > { %v2546_v13 = vmul.f32 %v4298_v33, %v2505_v10  ;;  %v2500_v47 = vpop.permute.xlu1 %2499  ;;  %2629 = vxpose.xlu1.b32.cont [4/8] (short) (narrow) %v2621_v24, 16 }
 0x2eb   : > { %v2545_v49 = vmul.f32 %v2500_v47, %v4303_v38 }
 0x2ec   : > { %v2562_v41 = vsel %vm1317_vm6, %v2546_v13, %v4336_v8 }
 0x2ed   : > { %v2578_v11 = vmax.f32 %v1327_v50, %v2562_v41  ;;  %v2561_v61 = vsel %vm1317_vm6, %v2545_v49, %v4339_v46  ;;  %v4575_v50 = vld [vmem:[#allocation12_spill] sm:$0xff] }
 0x2ee   : > { %v2577_v56 = vmax.f32 %v1326_v29, %v2561_v61 }
 0x2f0   : > { %v2589_v59 = vmax.f32 %v2577_v56, %v2578_v11  ;;  %v4577_v56 = vld [vmem:[#allocation14_spill] sm:$0xff] }
 0x2f1   : > { %v1279_v33 = vpop.permute.xlu0 %1278 }
 0x2f2   : > { %v1274_v36 = vpop.permute.xlu1 %1273  ;;  %vm2597_vm12 = vcmp.ge.f32.partialorder %v2589_v59, 0.0  ;;  %v2605_v2 = vmul.f32 0.1, %v2589_v59  ;;  %v1312_v38 = vmul.f32 %v4317_v22, %v1279_v33 }
 0x2f3   : > { %v1311_v6 = vmul.f32 %v1274_v36, %v4320_v5  ;;  %v4570_v5 = vld [vmem:[#allocation11_spill] sm:$0xff] }
 0x2f4   : > { %v2613_v16 = vsel %vm2597_vm12, %v2589_v59, %v2605_v2  ;;  %v1329_v14 = vsel %vm1317_vm6, %v1312_v38, %v4567_v15 }
 0x2f5   : > { %v2515_v20 = vpop.permute.xlu0 %2514  ;;  %v2622_v8 = vsel %vm2617_vm8, %v2613_v16, 0.0  ;;  %v1328_v22 = vsel %vm1317_vm6, %v1311_v6, %v4569_v37 }
 0x2f6   : > { %v2548_v63 = vmul.f32 %v4565_v19, %v2515_v20  ;;  %v2510_v55 = vpop.permute.xlu1 %2509  ;;  %2630 = vxpose.xlu1.b32.cont [5/8] (short) (narrow) %v2622_v8, 16 }
 0x2f7   : > { %v2547_v46 = vmul.f32 %v2510_v55, %v4566_v58 }
 0x2f8   : > { %v2564_v9 = vsel %vm1317_vm6, %v2548_v63, %v4568_v31 }
 0x2f9   : > { %v2580_v32 = vmax.f32 %v1329_v14, %v2564_v9  ;;  %v2563_v21 = vsel %vm1317_vm6, %v2547_v46, %v4570_v5 }
 0x2fa   : > { %v2579_v30 = vmax.f32 %v1328_v22, %v2563_v21 }
 0x2fc   : > { %v2590_v62 = vmax.f32 %v2579_v30, %v2580_v32 }
 0x2fd   : > { %v1289_v28 = vpop.permute.xlu0 %1288 }
 0x2fe   : > { %v1284_v43 = vpop.permute.xlu1 %1283  ;;  %vm2598_vm13 = vcmp.ge.f32.partialorder %v2590_v62, 0.0  ;;  %v2606_v34 = vmul.f32 0.1, %v2590_v62  ;;  %v1314_v48 = vmul.f32 %v4571_v40, %v1289_v28 }
 0x2ff   : > { %v1313_v44 = vmul.f32 %v1284_v43, %v4572_v57 }
 0x300   : > { %v2614_v45 = vsel %vm2598_vm13, %v2590_v62, %v2606_v34  ;;  %v1331_v35 = vsel %vm1317_vm6, %v1314_v48, %v4378_v27  ;;  %v4576_v27 = vld [vmem:[#allocation13_spill] sm:$0xff] }
 0x301   : > { %v2525_v25 = vpop.permute.xlu0 %2524  ;;  %v2623_v39 = vsel %vm2617_vm8, %v2614_v45, 0.0  ;;  %v1330_v51 = vsel %vm1317_vm6, %v1313_v44, %v4384_v1 }
 0x302   : > { %v2550_v17 = vmul.f32 %v4573_v26, %v2525_v25  ;;  %v2520_v52 = vpop.permute.xlu1 %2519  ;;  %2631 = vxpose.xlu1.b32.cont [6/8] (short) (narrow) %v2623_v39, 16 }
 0x303   : > { %v2549_v18 = vmul.f32 %v2520_v52, %v4574_v42 }
 0x304   : > { %v2566_v23 = vsel %vm1317_vm6, %v2550_v17, %v4392_v3 }
 0x305   : > { %v2582_v7 = vmax.f32 %v1331_v35, %v2566_v23  ;;  %v2565_v0 = vsel %vm1317_vm6, %v2549_v18, %v4395_v53  ;;  %v4578_v53 = vld [vmem:[#allocation15_spill] sm:$0xff] }
 0x306   : > { %v2581_v10 = vmax.f32 %v1330_v51, %v2565_v0 }
 0x308   : > { %v2591_v24 = vmax.f32 %v2581_v10, %v2582_v7 }
 0x309   : > { %v1299_v13 = vpop.permute.xlu0 %1298 }
 0x30a   : > { %v1294_v47 = vpop.permute.xlu1 %1293  ;;  %vm2599_vm14 = vcmp.ge.f32.partialorder %v2591_v24, 0.0  ;;  %v2607_v49 = vmul.f32 0.1, %v2591_v24  ;;  %v1316_v41 = vmul.f32 %v4575_v50, %v1299_v13 }
 0x30b   : > { %v1315_v11 = vmul.f32 %v1294_v47, %v4576_v27 }
 0x30c   : > { %v2615_v29 = vsel %vm2599_vm14, %v2591_v24, %v2607_v49  ;;  %v1333_v36 = vsel %vm1317_vm6, %v1316_v41, %v4401_v4 }
 0x30d   : > { %v2535_v61 = vpop.permute.xlu0 %2534  ;;  %v2624_v3 = vsel %vm2617_vm8, %v2615_v29, 0.0  ;;  %v1332_v38 = vsel %vm1317_vm6, %v1315_v11, %v4404_v60 }
 0x30e   : > { %v2552_v1 = vmul.f32 %v4577_v56, %v2535_v61  ;;  %v2530_v59 = vpop.permute.xlu1 %2529  ;;  %2632 = vxpose.xlu1.b32.cont [7/8] (short) (narrow) %v2624_v3, 16 }
 0x30f   : > { %v2551_v33 = vmul.f32 %v2530_v59, %v4578_v53 }
 0x310   : > { %v2568_v2 = vsel %vm1317_vm6, %v2552_v1, %v4409_v12 }
 0x311   : > { %v2584_v16 = vmax.f32 %v1333_v36, %v2568_v2  ;;  %v2567_v6 = vsel %vm1317_vm6, %v2551_v33, %v4411_v54 }
 0x312   : > { %v2583_v20 = vmax.f32 %v1332_v38, %v2567_v6 }
 0x314   : > { %v2592_v8 = vmax.f32 %v2583_v20, %v2584_v16 }
 0x316   : > { %vm2600_vm15 = vcmp.ge.f32.partialorder %v2592_v8, 0.0  ;;  %v2608_v19 = vmul.f32 0.1, %v2592_v8 }
 0x318   : > { %v2616_v63 = vsel %vm2600_vm15, %v2592_v8, %v2608_v19 }
 0x319   : > { %v2625_v55 = vsel %vm2617_vm8, %v2616_v63, 0.0 }
 0x31a   : > { %2633 = vxpose.xlu1.b32.end [8/8] (short) (narrow) %v2625_v55, 16 }
 0x37e   : > { %v2642_v4 = vpop.trf.xlu1 }
 0x37f   : > { %2659 = vst.msk [vmem:[%s170_s7] sm:$0xff] %vm2658_vm0, %v2642_v4 }
 0x382   : > { %v2643_v60 = vpop.trf.xlu1 }
 0x383   : > { %2661 = vst.msk [vmem:[%s170_s7 + $0x8] sm:$0x1] %vm2660_vm1, %v2643_v60 }
 0x384 PF: > { %s12_s11 = sadd.s32 1, %s3415_s11   ;;  %s4579_s9 = smov %s3411_s10 }
 0x385   : > { %p9_p5 = scmp.ge.s32.totalorder %s12_s11, 4   ;;  %s4580_s10 = smov %s4582_s12 }
 0x387   :  { %11 = sbr.rel (!%p9_p5) target bundleno = 2 (0x2), region = 62 }

</bundles_post_ra>
